<compile_context>
chip_gen: v7x
topology: tpu7x:2x2x1
jax: 0.10.0
libtpu: 0.0.40
codegen_flags: <defaults>
</compile_context>

<pallas_src>
import jax
import jax.numpy as jnp
from jax.experimental import pallas as pl
from jax.experimental.pallas import tpu as pltpu


_LANES = 128
_TM_MAX = 512                      # keep 512 on v5e/v6e/v7x (biggest tile that fits)
_VMEM_LIMIT_BYTES = 32 * 1024 * 1024
_BN_EPS = 1e-5
_PALLAS_MIN_ROWS = 512             # below this, a layer is cheaper as plain XLA


def _round_up(x, m):
    return (x + m - 1) // m * m


def _cdiv(a, b):
    return -(-a // b)


def _pad_k(kdim):
    # Prefer 256-aligned K (maps onto the 256x256 MXU of v6e/v7x) when nearly free.
    k256 = _round_up(kdim, 256)
    if k256 - kdim <= kdim // 8:
        return k256
    return _round_up(kdim, 128)


def _compiler_params():
    return pltpu.CompilerParams(
        dimension_semantics=("parallel",),     # independent M tiles (v7x megacore)
        vmem_limit_bytes=_VMEM_LIMIT_BYTES,
    )


# ---------------------------------------------------------------------------
# Pallas kernels
# ---------------------------------------------------------------------------
def _mm_bias_stats_kernel(p_ref, w_ref, b_ref, y_ref, ssum_ref, ssq_ref):
    # p: (TM, Kp) bf16, w: (Kp, Np) bf16, b: (1, Np) f32
    z = jnp.dot(p_ref[...], w_ref[...], preferred_element_type=jnp.float32)
    y_ref[...] = (z + b_ref[...]).astype(y_ref.dtype)
    # Per-tile partial BatchNorm statistics of the pre-bias product.  Zero-padded
    # M rows / K columns / N lanes (and the k=3 "fake" sub-pixel positions, whose
    # taps are all zero or hit zero padding) contribute exactly 0, so summing the
    # tiles and dividing by the true element count outside gives exact batch stats.
    ssum_ref[0] = jnp.sum(z, axis=0, keepdims=True)
    ssq_ref[0] = jnp.sum(z * z, axis=0, keepdims=True)


def _mm_bias_tanh_kernel(p_ref, w_ref, b_ref, y_ref):
    # Final layer: fused tanh epilogue, bf16 output (tanh range fits bf16 easily).
    z = jnp.dot(p_ref[...], w_ref[...], preferred_element_type=jnp.float32)
    y_ref[...] = jnp.tanh(z + b_ref[...]).astype(y_ref.dtype)


# ---------------------------------------------------------------------------
# pallas_call wrapper
# ---------------------------------------------------------------------------
def _conv_matmul(patches, wmat, bias2d, tm, *, with_stats, out_dtype):
    """Tiled (M_pad, Kp) x (Kp, Np) matmul + bias.
    with_stats=True : linear output + per-tile BN partial sums (hidden layers)
    with_stats=False: fused tanh epilogue (final layer)."""
    m_pad, kp = patches.shape
    np_ = wmat.shape[1]
    nt = m_pad // tm
    in_specs = [
        pl.BlockSpec((tm, kp), lambda i: (i, 0)),        # streamed patch row tile
        pl.BlockSpec((kp, np_), lambda i: (0, 0)),       # resident weight block
        pl.BlockSpec((1, np_), lambda i: (0, 0)),        # resident bias
    ]
    y_spec = pl.BlockSpec((tm, np_), lambda i: (i, 0))
    y_shape = jax.ShapeDtypeStruct((m_pad, np_), out_dtype)
    if with_stats:
        s_spec = pl.BlockSpec((1, 1, np_), lambda i: (i, 0, 0))
        s_shape = jax.ShapeDtypeStruct((nt, 1, np_), jnp.float32)
        return pl.pallas_call(
            _mm_bias_stats_kernel,
            grid=(nt,),
            in_specs=in_specs,
            out_specs=[y_spec, s_spec, s_spec],
            out_shape=[y_shape, s_shape, s_shape],
            compiler_params=_compiler_params(),
        )(patches, wmat, bias2d)
    return pl.pallas_call(
        _mm_bias_tanh_kernel,
        grid=(nt,),
        in_specs=in_specs,
        out_specs=y_spec,
        out_shape=y_shape,
        compiler_params=_compiler_params(),
    )(patches, wmat, bias2d)


# ---------------------------------------------------------------------------
# Merged-phase decomposition of a stride-2 ConvTranspose2d
# ---------------------------------------------------------------------------
# ConvTranspose2d (stride 2, padding 0):  y[o] = sum_e x[e] * w[o - 2e], 0 <= o-2e < k.
# Write o = 2t + a (phase a in {0,1}) and e = t - 1 + j (window slot j in {0,1}):
#     tap index d = a + 2 - 2j   (zero tap if d >= k).
# All 4 phases therefore share the same 2x2 input window around t, so one patch
# matrix of shape (N*Ty*Tx, 4*Cin) with Ty = H+1, Tx = W+1 feeds a single matmul
# against a (4*Cin, 4*Cout) weight whose columns are ordered (ay, ax, cout).
def _merged_weight(w, k, cin, cout):
    """w: (Cin, Cout, k, k) PyTorch ConvTranspose2d layout -> (4*Cin, 4*Cout)."""
    row_blocks = []
    for jy in range(2):
        for jx in range(2):
            taps = []
            for ay in range(2):
                for ax in range(2):
                    dy = ay + 2 - 2 * jy
                    dx = ax + 2 - 2 * jx
                    if dy < k and dx < k:
                        taps.append(w[:, :, dy, dx])                 # (Cin, Cout)
                    else:
                        taps.append(jnp.zeros((cin, cout), w.dtype))
            blk = jnp.stack(taps, axis=1)                            # (Cin, 4, Cout)
            row_blocks.append(blk.reshape(cin, 4 * cout))            # cols (ay, ax, co)
    return jnp.concatenate(row_blocks, axis=0)                       # rows (jy, jx, ci)


def _pallas_block(x, w, b, k, final):
    """One generator block on NHWC input via a single merged-phase Pallas matmul."""
    n, h, w_in, cin = x.shape
    cout = w.shape[1]
    ty, tx = h + 1, w_in + 1
    ho, wo = 2 * h + k - 2, 2 * w_in + k - 2
    m = n * ty * tx
    kdim = 4 * cin
    ntot = 4 * cout
    kp = _pad_k(kdim)
    np_ = _round_up(ntot, _LANES)

    # Tile selection: >=2 tiles (megacore), rows a multiple of 16 (bf16 sublanes),
    # padding waste bounded by one sublane group.
    nt = max(2, _cdiv(m, _TM_MAX))
    tm = _round_up(_cdiv(m, nt), 16)
    m_pad = nt * tm

    # Shared patch matrix: pad the activation by 1 on every spatial side, take
    # the 4 shifted 2x2 window views, concat along channels (jy, jx, ci).
    # BN+ReLU of the previous layer was already applied (fused) before padding,
    # so the zero padding is exact and padded patch rows stay exactly zero.
    xb = x.astype(jnp.bfloat16)
    xpad = jnp.pad(xb, ((0, 0), (1, 1), (1, 1), (0, 0)))
    cols = [xpad[:, jy:jy + ty, jx:jx + tx, :] for jy in range(2) for jx in range(2)]
    patches = jnp.concatenate(cols, axis=-1).reshape(m, kdim)
    patches = jnp.pad(patches, ((0, m_pad - m), (0, kp - kdim)))

    wmat = _merged_weight(w.astype(jnp.float32), k, cin, cout)
    wmat = jnp.pad(wmat, ((0, kp - kdim), (0, np_ - ntot))).astype(jnp.bfloat16)
    bias4 = jnp.pad(jnp.tile(b.astype(jnp.float32), 4), (0, np_ - ntot)).reshape(1, np_)

    if final:
        y_all = _conv_matmul(patches, wmat, bias4, tm,
                             with_stats=False, out_dtype=jnp.bfloat16)
        ssum = ssq = None
    else:
        y_all, ssum, ssq = _conv_matmul(patches, wmat, bias4, tm,
                                        with_stats=True, out_dtype=jnp.bfloat16)

    # Single pixel-shuffle interleave (replaces 4 strided scatters):
    #   (m, 4*cout) -> (n, ty, tx, ay, ax, c) -> (n, 2*ty, 2*tx, c) -> crop.
    y = y_all[:m, :ntot].reshape(n, ty, tx, 2, 2, cout)
    y = y.transpose(0, 1, 3, 2, 4, 5).reshape(n, 2 * ty, 2 * tx, cout)[:, :ho, :wo, :]

    if final:
        return y.astype(jnp.float32)

    # Exact batch statistics from the per-tile partial sums (pre-bias product z).
    count = float(n * ho * wo)
    zsum = jnp.sum(ssum, axis=(0, 1))[:ntot].reshape(4, cout).sum(axis=0)
    zsq = jnp.sum(ssq, axis=(0, 1))[:ntot].reshape(4, cout).sum(axis=0)
    mean_z = zsum / count
    mean_y = mean_z + b.astype(jnp.float32)
    # NOTE: single-pass E[z^2]-E[z]^2 in f32 is fine at this init/tolerance.
    var_y = jnp.maximum(zsq / count - mean_z * mean_z, 0.0)
    scale = jax.lax.rsqrt(var_y + _BN_EPS)          # gamma = 1
    shift = -mean_y * scale                         # beta  = 0

    # BN + ReLU fused into the pixel-shuffle epilogue (one pass, no extra kernel).
    return jnp.maximum(y.astype(jnp.float32) * scale + shift, 0.0).astype(jnp.bfloat16)


def _xla_block(x, w, b, k, final):
    """Plain-XLA path for the tiny early layers (launch/padding overhead would
    dominate a Pallas call of a few dozen rows on every TPU generation)."""
    x = x.astype(jnp.float32)
    kern = jnp.transpose(w[:, :, ::-1, ::-1], (2, 3, 0, 1))          # HWIO
    y = jax.lax.conv_general_dilated(
        x, kern, window_strides=(1, 1),
        padding=[(k - 1, k - 1), (k - 1, k - 1)],
        lhs_dilation=(2, 2),
        dimension_numbers=("NHWC", "HWIO", "NHWC"),
        precision=jax.lax.Precision.HIGHEST)
    y = y + b.reshape(1, 1, 1, -1)
    if final:
        return jnp.tanh(y)
    mean = jnp.mean(y, axis=(0, 1, 2), keepdims=True)
    var = jnp.mean(jnp.square(y - mean), axis=(0, 1, 2), keepdims=True)
    return jnp.maximum((y - mean) * jax.lax.rsqrt(var + _BN_EPS), 0.0)


def conv_transpose_block(x, w, b, k, final):
    n, h, w_in, _ = x.shape
    m = n * (h + 1) * (w_in + 1)
    if m < _PALLAS_MIN_ROWS:
        return _xla_block(x, w, b, k, final)
    return _pallas_block(x, w, b, k, final)


# ---------------------------------------------------------------------------
# Generator parameters + forward (API boundary: PyTorch NCHW convention)
# ---------------------------------------------------------------------------
def init_params(key, z_dim, im_chan, hidden_dim):
    chans = [z_dim, hidden_dim * 8, hidden_dim * 4, hidden_dim * 2, hidden_dim, im_chan]
    ksizes = [3, 3, 3, 3, 4]
    params = []
    for i in range(5):
        key, kw, kb = jax.random.split(key, 3)
        cin, cout, k = chans[i], chans[i + 1], ksizes[i]
        w = 0.05 * jax.random.normal(kw, (cin, cout, k, k), jnp.float32)
        b = 0.05 * jax.random.normal(kb, (cout,), jnp.float32)
        params.append((w, b, k))
    return params


def generator_forward(noise, params):
    n, z = noise.shape
    x = noise.reshape(n, 1, 1, z)              # (N, z, 1, 1) NCHW -> (N, 1, 1, z) NHWC
    for i, (w, b, k) in enumerate(params):
        final = i == len(params) - 1
        x = conv_transpose_block(x, w, b, k, final)
    return jnp.transpose(x, (0, 3, 1, 2))      # back to NCHW


def reference_forward(noise, params):
    """Pure-XLA f32 reference of the same module, for validation."""
    n, z = noise.shape
    x = noise.reshape(n, 1, 1, z)
    for i, (w, b, k) in enumerate(params):
        kern = jnp.transpose(w[:, :, ::-1, ::-1], (2, 3, 0, 1))     # HWIO
        y = jax.lax.conv_general_dilated(
            x, kern, window_strides=(1, 1),
            padding=[(k - 1, k - 1), (k - 1, k - 1)],
            lhs_dilation=(2, 2),
            dimension_numbers=("NHWC", "HWIO", "NHWC"),
            precision=jax.lax.Precision.HIGHEST)
        y = y + b.reshape(1, 1, 1, -1)
        if i < len(params) - 1:
            mean = jnp.mean(y, axis=(0, 1, 2), keepdims=True)
            var = jnp.mean(jnp.square(y - mean), axis=(0, 1, 2), keepdims=True)
            y = jnp.maximum((y - mean) * jax.lax.rsqrt(var + _BN_EPS), 0.0)
        else:
            y = jnp.tanh(y)
        x = y
    return jnp.transpose(x, (0, 3, 1, 2))


if __name__ == "__main__":
    key = jax.random.PRNGKey(0)
    z_dim, im_chan, hidden_dim = 10, 3, 8      # small hidden_dim for a quick run
    batch = 2

    key_p, key_n = jax.random.split(key)
    params = init_params(key_p, z_dim, im_chan, hidden_dim)
    noise = jax.random.normal(key_n, (batch, z_dim), jnp.float32)

    out = jax.jit(lambda nz: generator_forward(nz, params))(noise)
    jax.block_until_ready(out)

    # spatial progression: 1 -> 3 -> 7 -> 15 -> 31 -> 64
    assert out.shape == (batch, im_chan, 64, 64), out.shape
    assert out.dtype == jnp.float32
    assert bool(jnp.all(jnp.isfinite(out)))

    # Validate against a pure-XLA f32 reference of the same module (tolerance
    # covers bf16 MXU inputs / bf16 hidden activations on the Pallas layers).
    ref = jax.jit(lambda nz: reference_forward(nz, params))(noise)
    jax.block_until_ready(ref)
    max_err = float(jnp.max(jnp.abs(out - ref)))
    assert max_err < 1e-1, f"max abs error vs reference: {max_err}"

    print("KERNEL_OK")
</pallas_src>

<mosaic_0001>
module attributes {stable_mosaic.version = 11 : i64} {
  func.func @_mm_bias_stats_kernel(%arg0: i32, %arg1: memref<256x128xbf16, #tpu.memory_space<vmem>>, %arg2: memref<128x128xbf16, #tpu.memory_space<vmem>>, %arg3: memref<1x128xf32, #tpu.memory_space<vmem>>, %arg4: memref<256x128xbf16, #tpu.memory_space<vmem>>, %arg5: memref<1x1x128xf32, #tpu.memory_space<vmem>>, %arg6: memref<1x1x128xf32, #tpu.memory_space<vmem>>) attributes {dimension_semantics = [#tpu.dimension_semantics<parallel>], iteration_bounds = array<i64: 2>, scalar_prefetch = 0 : i64, scratch_operands = 0 : i64, tpu.core_type = #tpu.core_type<tc>, window_params = [{transform_indices = @transform_0, window_bounds = array<i64: 256, 128>}, {pipeline_mode = #tpu.pipeline_mode<synchronous>, transform_indices = @transform_1, window_bounds = array<i64: 128, 128>}, {pipeline_mode = #tpu.pipeline_mode<synchronous>, transform_indices = @transform_2, window_bounds = array<i64: 1, 128>}, {transform_indices = @transform_3, window_bounds = array<i64: 256, 128>}, {transform_indices = @transform_4, window_bounds = array<i64: 1, 1, 128>}, {transform_indices = @transform_5, window_bounds = array<i64: 1, 1, 128>}]} {
    %c0 = arith.constant 0 : index
    %c0_0 = arith.constant 0 : index
    %0 = vector.load %arg1[%c0, %c0_0] : memref<256x128xbf16, #tpu.memory_space<vmem>>, vector<256x128xbf16>
    %c0_1 = arith.constant 0 : index
    %c0_2 = arith.constant 0 : index
    %1 = vector.load %arg2[%c0_1, %c0_2] : memref<128x128xbf16, #tpu.memory_space<vmem>>, vector<128x128xbf16>
    %cst = arith.constant dense<0.000000e+00> : vector<256x128xf32>
    %2 = tpu.matmul %0, %1, %cst {dimension_numbers = #tpu.dot_dimension_numbers<[1], [0], [0], [1], [0, 0, 1, 1], [], []>} : vector<256x128xbf16>, vector<128x128xbf16>, vector<256x128xf32> -> vector<256x128xf32>
    %c0_3 = arith.constant 0 : index
    %c0_4 = arith.constant 0 : index
    %3 = vector.load %arg3[%c0_3, %c0_4] : memref<1x128xf32, #tpu.memory_space<vmem>>, vector<1x128xf32>
    %4 = vector.broadcast %3 : vector<1x128xf32> to vector<256x128xf32>
    %5 = arith.addf %2, %4 : vector<256x128xf32>
    %6 = arith.truncf %5 : vector<256x128xf32> to vector<256x128xbf16>
    %c0_5 = arith.constant 0 : index
    %c0_6 = arith.constant 0 : index
    %7 = vector.load %arg4[%c0_5, %c0_6] : memref<256x128xbf16, #tpu.memory_space<vmem>>, vector<256x128xbf16>
    tpu.vector_store %arg4[%c0_5, %c0_6], %6 {strides = array<i32>} : memref<256x128xbf16, #tpu.memory_space<vmem>>, vector<256x128xbf16>,
    %cst_7 = arith.constant dense<0.000000e+00> : vector<128xf32>
    %8 = vector.multi_reduction <add>, %2, %cst_7 [0] : vector<256x128xf32> to vector<128xf32>
    %9 = vector.shape_cast %8 : vector<128xf32> to vector<1x128xf32>
    %c0_8 = arith.constant 0 : index
    %c0_9 = arith.constant 0 : index
    %c0_10 = arith.constant 0 : index
    %10 = vector.load %arg5[%c0_8, %c0_9, %c0_10] : memref<1x1x128xf32, #tpu.memory_space<vmem>>, vector<1x1x128xf32>
    %11 = vector.shape_cast %10 : vector<1x1x128xf32> to vector<1x128xf32>
    %12 = vector.shape_cast %9 : vector<1x128xf32> to vector<1x1x128xf32>
    tpu.vector_store %arg5[%c0_8, %c0_9, %c0_10], %12 {strides = array<i32>} : memref<1x1x128xf32, #tpu.memory_space<vmem>>, vector<1x1x128xf32>,
    %13 = arith.mulf %2, %2 : vector<256x128xf32>
    %cst_11 = arith.constant dense<0.000000e+00> : vector<128xf32>
    %14 = vector.multi_reduction <add>, %13, %cst_11 [0] : vector<256x128xf32> to vector<128xf32>
    %15 = vector.shape_cast %14 : vector<128xf32> to vector<1x128xf32>
    %c0_12 = arith.constant 0 : index
    %c0_13 = arith.constant 0 : index
    %c0_14 = arith.constant 0 : index
    %16 = vector.load %arg6[%c0_12, %c0_13, %c0_14] : memref<1x1x128xf32, #tpu.memory_space<vmem>>, vector<1x1x128xf32>
    %17 = vector.shape_cast %16 : vector<1x1x128xf32> to vector<1x128xf32>
    %18 = vector.shape_cast %15 : vector<1x128xf32> to vector<1x1x128xf32>
    tpu.vector_store %arg6[%c0_12, %c0_13, %c0_14], %18 {strides = array<i32>} : memref<1x1x128xf32, #tpu.memory_space<vmem>>, vector<1x1x128xf32>,
    return
  }
  func.func @transform_0(%arg0: i32) -> (i32, i32) {
    %c0_i32 = arith.constant 0 : i32
    %c0_i32_0 = arith.constant 0 : i32
    return %arg0, %c0_i32 : i32, i32
  }
  func.func @transform_1(%arg0: i32) -> (i32, i32) {
    %c0_i32 = arith.constant 0 : i32
    %c0_i32_0 = arith.constant 0 : i32
    %c0_i32_1 = arith.constant 0 : i32
    return %c0_i32, %c0_i32_0 : i32, i32
  }
  func.func @transform_2(%arg0: i32) -> (i32, i32) {
    %c0_i32 = arith.constant 0 : i32
    %c0_i32_0 = arith.constant 0 : i32
    %c0_i32_1 = arith.constant 0 : i32
    return %c0_i32, %c0_i32_0 : i32, i32
  }
  func.func @transform_3(%arg0: i32) -> (i32, i32) {
    %c0_i32 = arith.constant 0 : i32
    %c0_i32_0 = arith.constant 0 : i32
    return %arg0, %c0_i32 : i32, i32
  }
  func.func @transform_4(%arg0: i32) -> (i32, i32, i32) {
    %c0_i32 = arith.constant 0 : i32
    %c0_i32_0 = arith.constant 0 : i32
    %c0_i32_1 = arith.constant 0 : i32
    return %arg0, %c0_i32, %c0_i32_0 : i32, i32, i32
  }
  func.func @transform_5(%arg0: i32) -> (i32, i32, i32) {
    %c0_i32 = arith.constant 0 : i32
    %c0_i32_0 = arith.constant 0 : i32
    %c0_i32_1 = arith.constant 0 : i32
    return %arg0, %c0_i32, %c0_i32_0 : i32, i32, i32
  }
}

module attributes {stable_mosaic.version = 11 : i64} {
  func.func @_mm_bias_tanh_kernel(%arg0: i32, %arg1: memref<512x128xbf16, #tpu.memory_space<vmem>>, %arg2: memref<128x128xbf16, #tpu.memory_space<vmem>>, %arg3: memref<1x128xf32, #tpu.memory_space<vmem>>, %arg4: memref<512x128xbf16, #tpu.memory_space<vmem>>) attributes {dimension_semantics = [#tpu.dimension_semantics<parallel>], iteration_bounds = array<i64: 4>, scalar_prefetch = 0 : i64, scratch_operands = 0 : i64, tpu.core_type = #tpu.core_type<tc>, window_params = [{transform_indices = @transform_0, window_bounds = array<i64: 512, 128>}, {pipeline_mode = #tpu.pipeline_mode<synchronous>, transform_indices = @transform_1, window_bounds = array<i64: 128, 128>}, {pipeline_mode = #tpu.pipeline_mode<synchronous>, transform_indices = @transform_2, window_bounds = array<i64: 1, 128>}, {transform_indices = @transform_3, window_bounds = array<i64: 512, 128>}]} {
    %c0 = arith.constant 0 : index
    %c0_0 = arith.constant 0 : index
    %0 = vector.load %arg1[%c0, %c0_0] : memref<512x128xbf16, #tpu.memory_space<vmem>>, vector<512x128xbf16>
    %c0_1 = arith.constant 0 : index
    %c0_2 = arith.constant 0 : index
    %1 = vector.load %arg2[%c0_1, %c0_2] : memref<128x128xbf16, #tpu.memory_space<vmem>>, vector<128x128xbf16>
    %cst = arith.constant dense<0.000000e+00> : vector<512x128xf32>
    %2 = tpu.matmul %0, %1, %cst {dimension_numbers = #tpu.dot_dimension_numbers<[1], [0], [0], [1], [0, 0, 1, 1], [], []>} : vector<512x128xbf16>, vector<128x128xbf16>, vector<512x128xf32> -> vector<512x128xf32>
    %c0_3 = arith.constant 0 : index
    %c0_4 = arith.constant 0 : index
    %3 = vector.load %arg3[%c0_3, %c0_4] : memref<1x128xf32, #tpu.memory_space<vmem>>, vector<1x128xf32>
    %4 = vector.broadcast %3 : vector<1x128xf32> to vector<512x128xf32>
    %5 = arith.addf %2, %4 : vector<512x128xf32>
    %6 = math.tanh %5 : vector<512x128xf32>
    %7 = arith.truncf %6 : vector<512x128xf32> to vector<512x128xbf16>
    %c0_5 = arith.constant 0 : index
    %c0_6 = arith.constant 0 : index
    %8 = vector.load %arg4[%c0_5, %c0_6] : memref<512x128xbf16, #tpu.memory_space<vmem>>, vector<512x128xbf16>
    tpu.vector_store %arg4[%c0_5, %c0_6], %7 {strides = array<i32>} : memref<512x128xbf16, #tpu.memory_space<vmem>>, vector<512x128xbf16>,
    return
  }
  func.func @transform_0(%arg0: i32) -> (i32, i32) {
    %c0_i32 = arith.constant 0 : i32
    %c0_i32_0 = arith.constant 0 : i32
    return %arg0, %c0_i32 : i32, i32
  }
  func.func @transform_1(%arg0: i32) -> (i32, i32) {
    %c0_i32 = arith.constant 0 : i32
    %c0_i32_0 = arith.constant 0 : i32
    %c0_i32_1 = arith.constant 0 : i32
    return %c0_i32, %c0_i32_0 : i32, i32
  }
  func.func @transform_2(%arg0: i32) -> (i32, i32) {
    %c0_i32 = arith.constant 0 : i32
    %c0_i32_0 = arith.constant 0 : i32
    %c0_i32_1 = arith.constant 0 : i32
    return %c0_i32, %c0_i32_0 : i32, i32
  }
  func.func @transform_3(%arg0: i32) -> (i32, i32) {
    %c0_i32 = arith.constant 0 : i32
    %c0_i32_0 = arith.constant 0 : i32
    return %arg0, %c0_i32 : i32, i32
  }
}

</mosaic_0001>

<bundles_post_ra>
// kernel: tile.15
= control target key start
LH: loop header
LB: loop body
LE: loop exit
PB: predicated region body
PF: predicated region fallthrough
CT: control target
= control target key end

     0   :  { %vm7_vm0 = vcmask 23552   ;;  %s37_s8 = smov 3   ;;  %s38_s9 = smov 6   ;;  %vm13_vm1 = vcmask 97352   ;;  %vm19_vm2 = vcmask 72752   ;;  %vm25_vm3 = vcmask 48152   ;;  %s55_s0 = inlined_call_operand.vmem [shape: f32[4,3], index: 0, kind: input, shape index: {}]   ;;  %s56_s1 = inlined_call_operand.vmem [shape: f32[12], index: 1, kind: output, shape index: {}]  }
   0x1   :  { %v4_v0 = vld [vmem:[%s55_s0] sm:$0xf]  ;;  %s36_s0 = smov 9  }
   0x2   :  { %5 = vst [vmem:[#allocation1] sm:$0xf] %v4_v0 }
   0x9   :  { %v10_v1 = vld [vmem:[#allocation1 + $0x3] sm:$0x1]   ;;  %v22_v2 = vld [vmem:[#allocation1 + $0x1] sm:$0x1]   ;;  %v6_v3 = vld [vmem:[#allocation1] sm:$0x1]  }
   0xa   :  { %11 = vrot.lane.b32.xlu0 %v10_v1, %s36_s0  ;;  %23 = vrot.lane.b32.xlu1 %v22_v2, %s37_s8  ;;  %v16_v4 = vld [vmem:[#allocation1 + $0x2] sm:$0x1]   ;;  %8 = vst.msk [vmem:[#allocation0] sm:$0x1] %vm7_vm0, %v6_v3  }
   0xe   :  { %17 = vrot.lane.b32.xlu0 %v16_v4, %s38_s9 }
  0x7c   :  { %v12_v5 = vpop.permute.xlu0 %11   ;;  %v24_v6 = vpop.permute.xlu1 %23  }
  0x7d   :  { %14 = vst.msk [vmem:[#allocation0] sm:$0x1] %vm13_vm1, %v12_v5  }
  0x80   :  { %v18_v7 = vpop.permute.xlu0 %17  }
  0x81   :  { %20 = vst.msk [vmem:[#allocation0] sm:$0x1] %vm19_vm2, %v18_v7  }
  0x82   :  { %26 = vst.msk [vmem:[#allocation0] sm:$0x1] %vm25_vm3, %v24_v6  }
  0x89   :  { %v30_v8 = vld [vmem:[#allocation0] sm:$0x1] }
  0x8a   :  { %32 = vst [vmem:[%s56_s1] sm:$0x1] %v30_v8 }

// kernel: tile.10
= control target key start
LH: loop header
LB: loop body
LE: loop exit
PB: predicated region body
PF: predicated region fallthrough
CT: control target
= control target key end

     0   :  { %2 = vsyncpa [#allocation1], 0  ;;  %s44_s6 = smov [#allocation0]   ;;  %s70_s0 = inlined_call_operand.hbm [shape: f32[8], index: 0, kind: input, shape index: {}]   ;;  %s71_s1 = inlined_call_operand.vmem [shape: f32[4,8], index: 1, kind: output, shape index: {}]  }
   0x1   :  { %s9_s7 = sshll.u32 %s44_s6, 4  ;;  %s20_s10 = scalar_lea.hbm %s70_s0, 16  ;;  %s10_s7 = int_to_ptr.vmem [resolvable:$true] %s9_s7 }
   0x2   :  { %p21_p0 = scmp.ne.s32.totalorder %s70_s0, %s20_s10  ;;  %p24_p1 = scmp.lt.u32.totalorder %s20_s10, %s70_s0 }
   0x4   :  { %p26_p2 = pnand %p24_p1, %p21_p0 }
   0x6   :  { %29 = shalt.err (!%p26_p2)
}
   0x7   :  { %s30_s15 = scalar_lea.vmem %s10_s7, 16  ;;  %s34_s16 = scalar_lea.vmem %s10_s7, 32 }
   0x8   :  { %p31_p3 = scmp.ne.s32.totalorder %s10_s7, %s30_s15  ;;  %p35_p4 = scmp.lt.s32.totalorder %s10_s7, %s10_s7 }
   0x9   :  { %p36_p5 = scmp.lt.s32.totalorder %s34_s16, %s30_s15 }
   0xb   :  { %p37_p6 = por %p36_p5, %p35_p4 }
   0xd   :  { %p38_p7 = pnand %p37_p6, %p31_p3 }
   0xf   :  { %41 = shalt.err (!%p38_p7)
}
  0x10   :  { %12 = dma.hbm_to_vmem [thread:$0]  %s70_s0, 16, %s10_s7, [#allocation1]  }
  0x11   :  { %42 = dma.done.wait [#allocation1], 16  }
  0x12   :  { %43 = vsyncadd [#allocation1], 4294967280  ;;  %v16_v0 = vld [vmem:[#allocation0] ss:$0 sm:$0xff] }
  0x13   :  { %17 = vst [vmem:[%s71_s1] sm:$0xf] %v16_v0 }
  0x14   :  { %18 = vsyncpa [#allocation1], 1 }

// kernel: tile.14
= control target key start
LH: loop header
LB: loop body
LE: loop exit
PB: predicated region body
PF: predicated region fallthrough
CT: control target
= control target key end

     0   :  { %2 = vsyncpa [#allocation1], 0  ;;  %s44_s6 = smov [#allocation0]   ;;  %s70_s0 = inlined_call_operand.hbm [shape: f32[3], index: 0, kind: input, shape index: {}]   ;;  %s71_s1 = inlined_call_operand.vmem [shape: f32[4,3], index: 1, kind: output, shape index: {}]  }
   0x1   :  { %s9_s7 = sshll.u32 %s44_s6, 4  ;;  %s20_s10 = scalar_lea.hbm %s70_s0, 16  ;;  %s10_s7 = int_to_ptr.vmem [resolvable:$true] %s9_s7 }
   0x2   :  { %p21_p0 = scmp.ne.s32.totalorder %s70_s0, %s20_s10  ;;  %p24_p1 = scmp.lt.u32.totalorder %s20_s10, %s70_s0 }
   0x4   :  { %p26_p2 = pnand %p24_p1, %p21_p0 }
   0x6   :  { %29 = shalt.err (!%p26_p2)
}
   0x7   :  { %s30_s15 = scalar_lea.vmem %s10_s7, 16  ;;  %s34_s16 = scalar_lea.vmem %s10_s7, 32 }
   0x8   :  { %p31_p3 = scmp.ne.s32.totalorder %s10_s7, %s30_s15  ;;  %p35_p4 = scmp.lt.s32.totalorder %s10_s7, %s10_s7 }
   0x9   :  { %p36_p5 = scmp.lt.s32.totalorder %s34_s16, %s30_s15 }
   0xb   :  { %p37_p6 = por %p36_p5, %p35_p4 }
   0xd   :  { %p38_p7 = pnand %p37_p6, %p31_p3 }
   0xf   :  { %41 = shalt.err (!%p38_p7)
}
  0x10   :  { %12 = dma.hbm_to_vmem [thread:$0]  %s70_s0, 16, %s10_s7, [#allocation1]  }
  0x11   :  { %42 = dma.done.wait [#allocation1], 16  }
  0x12   :  { %43 = vsyncadd [#allocation1], 4294967280  ;;  %v16_v0 = vld [vmem:[#allocation0] ss:$0 sm:$0xff] }
  0x13   :  { %17 = vst [vmem:[%s71_s1] sm:$0xf] %v16_v0 }
  0x14   :  { %18 = vsyncpa [#allocation1], 1 }

// kernel: tile.11
= control target key start
LH: loop header
LB: loop body
LE: loop exit
PB: predicated region body
PF: predicated region fallthrough
CT: control target
= control target key end

     0   :  { %vm7_vm0 = vcmask 64512   ;;  %s37_s8 = smov 8   ;;  %s38_s9 = smov 16   ;;  %vm13_vm1 = vcmask 261312   ;;  %vm19_vm2 = vcmask 195712   ;;  %vm25_vm3 = vcmask 130112   ;;  %s55_s0 = inlined_call_operand.vmem [shape: f32[4,8], index: 0, kind: input, shape index: {}]   ;;  %s56_s1 = inlined_call_operand.vmem [shape: f32[32], index: 1, kind: output, shape index: {}]  }
   0x1   :  { %v4_v0 = vld [vmem:[%s55_s0] sm:$0xf]  ;;  %s36_s0 = smov 24  }
   0x2   :  { %5 = vst [vmem:[#allocation1] sm:$0xf] %v4_v0 }
   0x9   :  { %v10_v1 = vld [vmem:[#allocation1 + $0x3] sm:$0x1]   ;;  %v22_v2 = vld [vmem:[#allocation1 + $0x1] sm:$0x1]   ;;  %v6_v3 = vld [vmem:[#allocation1] sm:$0x1]  }
   0xa   :  { %11 = vrot.lane.b32.xlu0 %v10_v1, %s36_s0  ;;  %23 = vrot.lane.b32.xlu1 %v22_v2, %s37_s8  ;;  %v16_v4 = vld [vmem:[#allocation1 + $0x2] sm:$0x1]   ;;  %8 = vst.msk [vmem:[#allocation0] sm:$0x1] %vm7_vm0, %v6_v3  }
   0xe   :  { %17 = vrot.lane.b32.xlu0 %v16_v4, %s38_s9 }
  0x7c   :  { %v12_v5 = vpop.permute.xlu0 %11   ;;  %v24_v6 = vpop.permute.xlu1 %23  }
  0x7d   :  { %14 = vst.msk [vmem:[#allocation0] sm:$0x1] %vm13_vm1, %v12_v5  }
  0x80   :  { %v18_v7 = vpop.permute.xlu0 %17  }
  0x81   :  { %20 = vst.msk [vmem:[#allocation0] sm:$0x1] %vm19_vm2, %v18_v7  }
  0x82   :  { %26 = vst.msk [vmem:[#allocation0] sm:$0x1] %vm25_vm3, %v24_v6  }
  0x89   :  { %v30_v8 = vld [vmem:[#allocation0] sm:$0x1] }
  0x8a   :  { %32 = vst [vmem:[%s56_s1] sm:$0x1] %v30_v8 }

// kernel: _lambda_.2
= control target key start
LH: loop header
LB: loop body
LE: loop exit
PB: predicated region body
PF: predicated region fallthrough
CT: control target
= control target key end

     0   :  { %11 = vsyncpa [#allocation3], 0  ;;  %s1442_s18 = smov 0   ;;  %s1675_s0 = inlined_call_operand.vmem [shape: bf16[512,128], index: 0, kind: input, shape index: {}]   ;;  %s1676_s1 = inlined_call_operand.hbm [shape: bf16[128,128], index: 1, kind: input, shape index: {}]   ;;  %s1677_s2 = inlined_call_operand.vmem [shape: f32[1,128], index: 2, kind: input, shape index: {}]   ;;  %s1678_s3 = inlined_call_operand.vmem [shape: bf16[512,128], index: 3, kind: output, shape index: {0}]   ;;  %s1679_s4 = inlined_call_operand.vmem [shape: f32[2,1,128], index: 4, kind: output, shape index: {1}]   ;;  %s1680_s5 = inlined_call_operand.vmem [shape: f32[2,1,128], index: 5, kind: output, shape index: {2}]  }
   0x1 LB: > { %s1448_s19 = sadd.s32 4294967295, %s1407_s18   ;;  %p1041_p0 = scmp.ge.s32.totalorder %s1407_s18, 1  ;;  %s1407_s18 = sphi %s1442_s18, %s17_s18  }
   0x2   : > { %p168_p1 = scmp.lt.s32.totalorder %s1407_s18, 3  ;;  %s1409_s20 = smov [#allocation2]  }
   0x3   : > { %s180_s21 = sshll.u32 %s1409_s20, 4  ;;  %p1681_p3 = scmp.eq.s32.totalorder %s1448_s19, 0  ;;  %s181_s21 = int_to_ptr.vmem [resolvable:$true] %s180_s21 }
   0x4   : > { %p1452_p2 = pnand %p1041_p0, %p168_p1  ;;  %s1369_s26 = scalar_lea.hbm %s1676_s1, 1024 }
   0x5   : > { %p1370_p6 = scmp.ne.s32.totalorder %s1676_s1, %s1369_s26  ;;  %p1376_p10 = scmp.lt.u32.totalorder %s1369_s26, %s1676_s1 }
   0x6   : > { %s1683_s22 = scalar_select %p1452_p2, 1, 0 }
   0x7   : > { %p1328_p4 = pneg %p1452_p2 }
   0x9   : > { %p1461_p5 = pnand %p1681_p3, %p1328_p4 }
   0xb   : > { %p1371_p7 = pneg %p1461_p5 }
   0xd   : > { %p1372_p8 = pnand %p1371_p7, %p1370_p6 }
   0xf   : > { %p1373_p9 = pneg %p1372_p8 }
  0x11   : > { %p1378_p11 = pnand %p1376_p10, %p1373_p9 }
  0x13   : > { %1381 = shalt.err (!%p1378_p11)
}
  0x14   : > { %s1382_s6 = scalar_lea.vmem %s181_s21, 1024  ;;  %p1390_p1 = scmp.lt.s32.totalorder %s181_s21, %s181_s21 }
  0x15   : > { %p1383_p12 = scmp.ne.s32.totalorder %s181_s21, %s1382_s6  ;;  %p1391_p4 = scmp.lt.s32.totalorder %s1382_s6, %s1382_s6 }
  0x17   : > { %p1385_p13 = pnand %p1383_p12, %p1371_p7  ;;  %p1392_p3 = por %p1391_p4, %p1390_p1 }
  0x19   : > { %p1386_p0 = pneg %p1385_p13 }
  0x1b   : > { %p1393_p2 = pnand %p1392_p3, %p1386_p0 }
  0x1d   : > { %1396 = shalt.err (!%p1393_p2)
}
  0x1e   : > { %s1410_s7 = smov 64   ;;  %s1411_s8 = smov 4  }
  0x1f   : > { %1331 = dma.hbm_to_vmem [thread:$0]  (!%p1461_p5), %s1676_s1, 1024, %s181_s21, [#allocation3], %s1410_s7, %s1410_s7, %s1411_s8  }
  0x20   : > { %p1685_p6 = scmp.ne.s32.totalorder %s1683_s22, 0 }
  0x21   : > { %p1686_p8 = scmp.eq.s32.totalorder (!%p1685_p6), %s1448_s19, 0 }
  0x22   : > { %208 = sbr.rel (%p1685_p6) target bundleno = 367 (0x16f), region = 32 }
  0x29   : > { %1402 = dma.done.wait (%p1686_p8), [#allocation3], 1024   ;;  %p1687_p7 = pmov %p1686_p8 }
  0x2a   : > { %s1046_s11 = sshll.u32 %s1448_s19, 5  ;;  %v1345_v0 = vld [vmem:[#allocation2] sm:$0xff]   ;;  %v1346_v1 = vld [vmem:[#allocation2 + $0x8] sm:$0xff]   ;;  %v1347_v2 = vld [vmem:[#allocation2 + $0x10] sm:$0xff]   ;;  %p254_p3 = scmp.lt.s32.totalorder %s1448_s19, 1 }
  0x2b   : > { %1404 = vsyncadd (%p1687_p7), [#allocation3], 4294966272  ;;  %p243_p2 = scmp.lt.s32.totalorder %s1046_s11, 63  ;;  %1260 = vmatprep.subr.bf16.mxu0 %v1345_v0  ;;  %1308 = vmatprep.subr.bf16.mxu1 %v1345_v0  ;;  %v1348_v3 = vld [vmem:[#allocation2 + $0x18] sm:$0xff]   ;;  %v1349_v5 = vld [vmem:[#allocation2 + $0x20] sm:$0xff]  }
  0x2c   : > { %1261 = vmatpush3.bf16.msra.mxu0 %v1345_v0  ;;  %1316 = vmatpush3.bf16.msra.mxu1 %v1345_v0  ;;  %v1350_v6 = vld [vmem:[#allocation2 + $0x28] sm:$0xff]   ;;  %v1351_v8 = vld [vmem:[#allocation2 + $0x30] sm:$0xff]   ;;  %v1352_v9 = vld [vmem:[#allocation2 + $0x38] sm:$0xff]   ;;  %s1691_s19 = smov (!%p254_p3, %s1448_s19), 1 }
  0x2d   : > { %s1689_s11 = smov (!%p243_p2, %s1046_s11), 63  ;;  %1262 = vmatprep.subr.bf16.mxu0 %v1346_v1  ;;  %1309 = vmatprep.subr.bf16.mxu1 %v1346_v1  ;;  %v1517_v24 = vld [vmem:[%s1677_s2] ss:$0 sm:$0xff]  ;;  %s256_s25 = scalar_lea.vmem %s1679_s4, %s1691_s19 }
  0x2e   : > { %s1047_s12 = sshll.u32 %s1689_s11, 2  ;;  %s259_s28 = scalar_lea.vmem %s1680_s5, %s1691_s19 }
  0x2f   : > { %s1496_s15 = scalar_lea.vmem %s1675_s0, %s1047_s12  ;;  %s1541_s22 = scalar_lea.vmem %s1678_s3, %s1047_s12 }
  0x30   : > { %1263 = vmatpush3.bf16.msra.mxu0 %v1346_v1  ;;  %1317 = vmatpush3.bf16.msra.mxu1 %v1346_v1  ;;  %v1353_v4 = vld [vmem:[%s1496_s15] sm:$0xff]   ;;  %v1354_v10 = vld [vmem:[%s1496_s15 + $0x8] sm:$0xff]   ;;  %v1355_v12 = vld [vmem:[%s1496_s15 + $0x10] sm:$0xff]  }
  0x31   : > { %1264 = vmatprep.subr.bf16.mxu0 %v1347_v2  ;;  %1310 = vmatprep.subr.bf16.mxu1 %v1347_v2  ;;  %v1361_v7 = vld [vmem:[%s1496_s15 + $0x40] sm:$0xff]   ;;  %v1362_v11 = vld [vmem:[%s1496_s15 + $0x48] sm:$0xff]   ;;  %v1363_v13 = vld [vmem:[%s1496_s15 + $0x50] sm:$0xff]  }
  0x32   : > { %1276 = vmatprep.mubr.bf16.mxu0 %v1353_v4  ;;  %1292 = vmatprep.mubr.bf16.mxu1 %v1361_v7  ;;  %v1356_v14 = vld [vmem:[%s1496_s15 + $0x18] sm:$0xff]   ;;  %v1357_v16 = vld [vmem:[%s1496_s15 + $0x20] sm:$0xff]   ;;  %v1358_v18 = vld [vmem:[%s1496_s15 + $0x28] sm:$0xff]  }
  0x33   : > { %v1364_v15 = vld [vmem:[%s1496_s15 + $0x58] sm:$0xff]   ;;  %v1365_v17 = vld [vmem:[%s1496_s15 + $0x60] sm:$0xff]   ;;  %v1366_v19 = vld [vmem:[%s1496_s15 + $0x68] sm:$0xff]  }
  0x34   : > { %1265 = vmatpush3.bf16.msra.mxu0 %v1347_v2  ;;  %1318 = vmatpush3.bf16.msra.mxu1 %v1347_v2  ;;  %v1359_v20 = vld [vmem:[%s1496_s15 + $0x30] sm:$0xff]   ;;  %v1360_v22 = vld [vmem:[%s1496_s15 + $0x38] sm:$0xff]  }
  0x35   : > { %1266 = vmatprep.subr.bf16.mxu0 %v1348_v3  ;;  %1311 = vmatprep.subr.bf16.mxu1 %v1348_v3  ;;  %v1367_v21 = vld [vmem:[%s1496_s15 + $0x70] sm:$0xff]   ;;  %v1368_v23 = vld [vmem:[%s1496_s15 + $0x78] sm:$0xff]  }
  0x38   : > { %1267 = vmatpush3.bf16.msra.mxu0 %v1348_v3  ;;  %1319 = vmatpush3.bf16.msra.mxu1 %v1348_v3 }
  0x39   : > { %1268 = vmatprep.subr.bf16.mxu0 %v1349_v5  ;;  %1312 = vmatprep.subr.bf16.mxu1 %v1349_v5 }
  0x3c   : > { %1269 = vmatpush3.bf16.msra.mxu0 %v1349_v5  ;;  %1320 = vmatpush3.bf16.msra.mxu1 %v1349_v5 }
  0x3d   : > { %1270 = vmatprep.subr.bf16.mxu0 %v1350_v6  ;;  %1313 = vmatprep.subr.bf16.mxu1 %v1350_v6 }
  0x40   : > { %1271 = vmatpush3.bf16.msra.mxu0 %v1350_v6  ;;  %1321 = vmatpush3.bf16.msra.mxu1 %v1350_v6 }
  0x41   : > { %1272 = vmatprep.subr.bf16.mxu0 %v1351_v8  ;;  %1314 = vmatprep.subr.bf16.mxu1 %v1351_v8 }
  0x44   : > { %1273 = vmatpush3.bf16.msra.mxu0 %v1351_v8  ;;  %1322 = vmatpush3.bf16.msra.mxu1 %v1351_v8 }
  0x45   : > { %1274 = vmatprep.subr.bf16.mxu0 %v1352_v9  ;;  %1315 = vmatprep.subr.bf16.mxu1 %v1352_v9 }
  0x48   : > { %1275 = vmatpush3.bf16.msra.mxu0 %v1352_v9  ;;  %1323 = vmatpush3.bf16.msra.mxu1 %v1352_v9 }
  0x4b   : > { %1277 = vmatmul.mubr.bf16.vlgmr.msra.gmra.mrb[0].mxu0 %v1354_v10  ;;  %1293 = vmatmul.mubr.bf16.vlgmr.msra.gmra.mrb[0].mxu1 %v1362_v11 }
  0x4c   : > { %1280 = vmatprep.mubr.bf16.mxu0 %v1355_v12  ;;  %1296 = vmatprep.mubr.bf16.mxu1 %v1363_v13 }
  0x53   : > { %1281 = vmatmul.mubr.bf16.gmra.mrb[4].mxu0 %v1356_v14  ;;  %1297 = vmatmul.mubr.bf16.gmra.mrb[4].mxu1 %v1364_v15 }
  0x54   : > { %1284 = vmatprep.mubr.bf16.mxu0 %v1357_v16  ;;  %1300 = vmatprep.mubr.bf16.mxu1 %v1365_v17 }
  0x5b   : > { %1285 = vmatmul.mubr.bf16.gmra.mrb[8].mxu0 %v1358_v18  ;;  %1301 = vmatmul.mubr.bf16.gmra.mrb[8].mxu1 %v1366_v19 }
  0x5c   : > { %1288 = vmatprep.mubr.bf16.mxu0 %v1359_v20  ;;  %1304 = vmatprep.mubr.bf16.mxu1 %v1367_v21 }
  0x63   : > { %1289 = vmatmul.mubr.bf16.gmra.mrb[12].mxu0 %v1360_v22  ;;  %1305 = vmatmul.mubr.bf16.gmra.mrb[12].mxu1 %v1368_v23 }
 0x11e   : > { %v1278_v25 = vpop.f32.mrb[0].mxu0  ;;  %v1519_v26 = vpop.f32.mrb[0].mxu1 }
 0x11f   : > { %v487_v27 = vpop.f32.mrb[1].mxu0  ;;  %v639_v28 = vadd.f32 %v1519_v26, %v1517_v24  ;;  %v1523_v29 = vpop.f32.mrb[1].mxu1  ;;  %v623_v30 = vadd.f32 %v1278_v25, %v1517_v24  ;;  %v853_v44 = vmul.f32 %v1278_v25, %v1278_v25 }
 0x120   : > { %v1279_v31 = vpop.f32.mrb[2].mxu0  ;;  %v637_v32 = vadd.f32 %v1517_v24, %v1523_v29  ;;  %v1528_v33 = vpop.f32.mrb[2].mxu1  ;;  %v621_v34 = vadd.f32 %v1517_v24, %v487_v27  ;;  %v851_v35 = vmul.f32 %v487_v27, %v487_v27 }
 0x121   : > { %v624_v36 = vadd.f32 %v1279_v31, %v1517_v24  ;;  %v490_v37 = vpop.f32.mrb[3].mxu0  ;;  %v640_v38 = vadd.f32 %v1528_v33, %v1517_v24  ;;  %v1534_v39 = vpop.f32.mrb[3].mxu1  ;;  %v854_v51 = vmul.f32 %v1279_v31, %v1279_v31 }
 0x122   : > { %v622_v40 = vadd.f32 %v1517_v24, %v490_v37  ;;  %v813_v41 = vadd.f32 %v490_v37, %v487_v27  ;;  %v852_v42 = vmul.f32 %v490_v37, %v490_v37  ;;  %v638_v43 = vadd.f32 %v1517_v24, %v1534_v39 }
 0x123   : > { %v1149_v45 = vpack.c.bf16 %v624_v36, %v623_v30  ;;  %v1189_v46 = vpack.c.bf16 %v640_v38, %v639_v28 }
 0x124   : > { %v1144_v47 = vpack.c.bf16 %v622_v40, %v621_v34  ;;  %v814_v48 = vadd.f32 %v1278_v25, %v813_v41  ;;  %v883_v49 = vadd.f32 %v852_v42, %v851_v35  ;;  %v1184_v50 = vpack.c.bf16 %v638_v43, %v637_v32 }
 0x125   : > { %1221 = vst [vmem:[%s1541_s22 + $0x8] sm:$0xff] %v1149_v45   ;;  %1229 = vst [vmem:[%s1541_s22 + $0x48] sm:$0xff] %v1189_v46  }
 0x126   : > { %1145 = vst [vmem:[%s1541_s22] sm:$0xff] %v1144_v47   ;;  %v884_v52 = vadd.f32 %v883_v49, %v853_v44  ;;  %v1282_v53 = vpop.f32.mrb[4].mxu0  ;;  %v815_v54 = vadd.f32 %v1279_v31, %v814_v48  ;;  %1228 = vst [vmem:[%s1541_s22 + $0x40] sm:$0xff] %v1184_v50   ;;  %v1550_v55 = vpop.f32.mrb[4].mxu1 }
 0x127   : > { %v503_v56 = vpop.f32.mrb[5].mxu0  ;;  %v1552_v57 = vpop.f32.mrb[5].mxu1  ;;  %v627_v58 = vadd.f32 %v1282_v53, %v1517_v24  ;;  %v643_v3 = vadd.f32 %v1550_v55, %v1517_v24  ;;  %v857_v13 = vmul.f32 %v1282_v53, %v1282_v53 }
 0x128   : > { %v816_v59 = vadd.f32 %v815_v54, %v503_v56  ;;  %v855_v60 = vmul.f32 %v503_v56, %v503_v56  ;;  %v885_v61 = vadd.f32 %v884_v52, %v854_v51  ;;  %v1283_v62 = vpop.f32.mrb[6].mxu0  ;;  %v1555_v63 = vpop.f32.mrb[6].mxu1  ;;  %v625_v0 = vadd.f32 %v1517_v24, %v503_v56 }
 0x129   : > { %v628_v1 = vadd.f32 %v1283_v62, %v1517_v24  ;;  %v506_v2 = vpop.f32.mrb[7].mxu0  ;;  %v641_v4 = vadd.f32 %v1517_v24, %v1552_v57  ;;  %v1563_v5 = vpop.f32.mrb[7].mxu1  ;;  %v644_v11 = vadd.f32 %v1555_v63, %v1517_v24  ;;  %v858_v19 = vmul.f32 %v1283_v62, %v1283_v62 }
 0x12a   : > { %v886_v6 = vadd.f32 %v885_v61, %v855_v60  ;;  %v626_v7 = vadd.f32 %v1517_v24, %v506_v2  ;;  %v817_v8 = vadd.f32 %v816_v59, %v506_v2  ;;  %v856_v9 = vmul.f32 %v506_v2, %v506_v2 }
 0x12b   : > { %v1159_v10 = vpack.c.bf16 %v628_v1, %v627_v58  ;;  %v642_v12 = vadd.f32 %v1517_v24, %v1563_v5  ;;  %v1199_v17 = vpack.c.bf16 %v644_v11, %v643_v3 }
 0x12c   : > { %v1154_v14 = vpack.c.bf16 %v626_v7, %v625_v0  ;;  %v818_v15 = vadd.f32 %v1282_v53, %v817_v8  ;;  %v887_v16 = vadd.f32 %v886_v6, %v856_v9 }
 0x12d   : > { %1223 = vst [vmem:[%s1541_s22 + $0x18] sm:$0xff] %v1159_v10   ;;  %v1194_v18 = vpack.c.bf16 %v642_v12, %v641_v4  ;;  %1231 = vst [vmem:[%s1541_s22 + $0x58] sm:$0xff] %v1199_v17  }
 0x12e   : > { %1222 = vst [vmem:[%s1541_s22 + $0x10] sm:$0xff] %v1154_v14   ;;  %v888_v20 = vadd.f32 %v887_v16, %v857_v13  ;;  %v1286_v21 = vpop.f32.mrb[8].mxu0  ;;  %v819_v22 = vadd.f32 %v1283_v62, %v818_v15  ;;  %v1572_v23 = vpop.f32.mrb[8].mxu1 }
 0x12f   : > { %v519_v25 = vpop.f32.mrb[9].mxu0  ;;  %1230 = vst [vmem:[%s1541_s22 + $0x50] sm:$0xff] %v1194_v18   ;;  %v1576_v27 = vpop.f32.mrb[9].mxu1  ;;  %v631_v28 = vadd.f32 %v1286_v21, %v1517_v24  ;;  %v647_v40 = vadd.f32 %v1572_v23, %v1517_v24  ;;  %v861_v50 = vmul.f32 %v1286_v21, %v1286_v21 }
 0x130   : > { %v820_v30 = vadd.f32 %v819_v22, %v519_v25  ;;  %v859_v31 = vmul.f32 %v519_v25, %v519_v25  ;;  %v889_v32 = vadd.f32 %v888_v20, %v858_v19  ;;  %v1287_v34 = vpop.f32.mrb[10].mxu0  ;;  %v1579_v35 = vpop.f32.mrb[10].mxu1  ;;  %v629_v36 = vadd.f32 %v1517_v24, %v519_v25 }
 0x131   : > { %v632_v37 = vadd.f32 %v1287_v34, %v1517_v24  ;;  %v522_v38 = vpop.f32.mrb[11].mxu0  ;;  %v645_v41 = vadd.f32 %v1517_v24, %v1576_v27  ;;  %v1587_v42 = vpop.f32.mrb[11].mxu1  ;;  %v648_v48 = vadd.f32 %v1579_v35, %v1517_v24  ;;  %v862_v58 = vmul.f32 %v1287_v34, %v1287_v34 }
 0x132   : > { %v890_v43 = vadd.f32 %v889_v32, %v859_v31  ;;  %v630_v44 = vadd.f32 %v1517_v24, %v522_v38  ;;  %v821_v45 = vadd.f32 %v820_v30, %v522_v38  ;;  %v860_v46 = vmul.f32 %v522_v38, %v522_v38 }
 0x133   : > { %v1169_v47 = vpack.c.bf16 %v632_v37, %v631_v28  ;;  %v646_v49 = vadd.f32 %v1517_v24, %v1587_v42  ;;  %v1209_v54 = vpack.c.bf16 %v648_v48, %v647_v40  ;;  %v867_v38 = vmul.f32 %v1523_v29, %v1523_v29 }
 0x134   : > { %v1164_v51 = vpack.c.bf16 %v630_v44, %v629_v36  ;;  %v822_v52 = vadd.f32 %v1286_v21, %v821_v45  ;;  %v891_v53 = vadd.f32 %v890_v43, %v860_v46  ;;  %v868_v44 = vmul.f32 %v1534_v39, %v1534_v39 }
 0x135   : > { %1225 = vst [vmem:[%s1541_s22 + $0x28] sm:$0xff] %v1169_v47   ;;  %v1204_v56 = vpack.c.bf16 %v646_v49, %v645_v41  ;;  %1233 = vst [vmem:[%s1541_s22 + $0x68] sm:$0xff] %v1209_v54   ;;  %v869_v45 = vmul.f32 %v1519_v26, %v1519_v26  ;;  %v870_v48 = vmul.f32 %v1528_v33, %v1528_v33 }
 0x136   : > { %1224 = vst [vmem:[%s1541_s22 + $0x20] sm:$0xff] %v1164_v51   ;;  %v892_v59 = vadd.f32 %v891_v53, %v861_v50  ;;  %v1290_v60 = vpop.f32.mrb[12].mxu0  ;;  %v823_v61 = vadd.f32 %v1287_v34, %v822_v52  ;;  %v1596_v62 = vpop.f32.mrb[12].mxu1  ;;  %v872_v54 = vmul.f32 %v1563_v5, %v1563_v5 }
 0x137   : > { %v535_v0 = vpop.f32.mrb[13].mxu0  ;;  %1232 = vst [vmem:[%s1541_s22 + $0x60] sm:$0xff] %v1204_v56   ;;  %v1600_v1 = vpop.f32.mrb[13].mxu1  ;;  %v635_v2 = vadd.f32 %v1290_v60, %v1517_v24  ;;  %v651_v12 = vadd.f32 %v1596_v62, %v1517_v24  ;;  %v865_v22 = vmul.f32 %v1290_v60, %v1290_v60 }
 0x138   : > { %v824_v3 = vadd.f32 %v823_v61, %v535_v0  ;;  %v863_v4 = vmul.f32 %v535_v0, %v535_v0  ;;  %v893_v6 = vadd.f32 %v892_v59, %v862_v58  ;;  %v1291_v7 = vpop.f32.mrb[14].mxu0  ;;  %v1603_v8 = vpop.f32.mrb[14].mxu1  ;;  %v633_v9 = vadd.f32 %v1517_v24, %v535_v0 }
 0x139   : > { %v636_v10 = vadd.f32 %v1291_v7, %v1517_v24  ;;  %v538_v11 = vpop.f32.mrb[15].mxu0  ;;  %v649_v13 = vadd.f32 %v1517_v24, %v1600_v1  ;;  %v602_v14 = vpop.f32.mrb[15].mxu1  ;;  %v652_v20 = vadd.f32 %v1603_v8, %v1517_v24  ;;  %v866_v34 = vmul.f32 %v1291_v7, %v1291_v7 }
 0x13a   : > { %v894_v15 = vadd.f32 %v893_v6, %v863_v4  ;;  %v634_v16 = vadd.f32 %v1517_v24, %v538_v11  ;;  %v825_v17 = vadd.f32 %v824_v3, %v538_v11  ;;  %v864_v18 = vmul.f32 %v538_v11, %v538_v11 }
 0x13b   : > { %v1179_v19 = vpack.c.bf16 %v636_v10, %v635_v2  ;;  %v650_v21 = vadd.f32 %v1517_v24, %v602_v14  ;;  %v1219_v31 = vpack.c.bf16 %v652_v20, %v651_v12  ;;  %v876_v3 = vmul.f32 %v1587_v42, %v1587_v42 }
 0x13c   : > { %v1174_v25 = vpack.c.bf16 %v634_v16, %v633_v9  ;;  %v826_v28 = vadd.f32 %v1290_v60, %v825_v17  ;;  %v895_v30 = vadd.f32 %v894_v15, %v864_v18  ;;  %v879_v9 = vmul.f32 %v1600_v1, %v1600_v1 }
 0x13d   : > { %1227 = vst [vmem:[%s1541_s22 + $0x38] sm:$0xff] %v1179_v19   ;;  %v1214_v32 = vpack.c.bf16 %v650_v21, %v649_v13  ;;  %1235 = vst [vmem:[%s1541_s22 + $0x78] sm:$0xff] %v1219_v31   ;;  %v880_v13 = vmul.f32 %v602_v14, %v602_v14  ;;  %v882_v17 = vmul.f32 %v1603_v8, %v1603_v8 }
 0x13e   : > { %1226 = vst [vmem:[%s1541_s22 + $0x30] sm:$0xff] %v1174_v25   ;;  %v896_v36 = vadd.f32 %v895_v30, %v865_v22  ;;  %v827_v37 = vadd.f32 %v1291_v7, %v826_v28 }
 0x13f   : > { %1234 = vst [vmem:[%s1541_s22 + $0x70] sm:$0xff] %v1214_v32  }
 0x140   : > { %v828_v40 = vadd.f32 %v827_v37, %v1523_v29  ;;  %v897_v41 = vadd.f32 %v896_v36, %v866_v34  ;;  %v871_v29 = vmul.f32 %v1552_v57, %v1552_v57 }
 0x142   : > { %v898_v24 = vadd.f32 %v897_v41, %v867_v38  ;;  %v829_v43 = vadd.f32 %v828_v40, %v1534_v39 }
 0x144   : > { %v830_v46 = vadd.f32 %v1519_v26, %v829_v43  ;;  %v899_v47 = vadd.f32 %v898_v24, %v868_v44  ;;  %v873_v26 = vmul.f32 %v1550_v55, %v1550_v55 }
 0x146   : > { %v900_v49 = vadd.f32 %v899_v47, %v869_v45  ;;  %v831_v50 = vadd.f32 %v1528_v33, %v830_v46  ;;  %v874_v33 = vmul.f32 %v1555_v63, %v1555_v63 }
 0x148   : > { %v832_v51 = vadd.f32 %v831_v50, %v1552_v57  ;;  %v901_v52 = vadd.f32 %v900_v49, %v870_v48  ;;  %v875_v57 = vmul.f32 %v1576_v27, %v1576_v27 }
 0x14a   : > { %v902_v53 = vadd.f32 %v901_v52, %v871_v29  ;;  %v833_v39 = vadd.f32 %v832_v51, %v1563_v5 }
 0x14c   : > { %v834_v56 = vadd.f32 %v1550_v55, %v833_v39  ;;  %v903_v58 = vadd.f32 %v902_v53, %v872_v54  ;;  %v877_v55 = vmul.f32 %v1572_v23, %v1572_v23 }
 0x14e   : > { %v904_v59 = vadd.f32 %v903_v58, %v873_v26  ;;  %v835_v60 = vadd.f32 %v1555_v63, %v834_v56  ;;  %v878_v63 = vmul.f32 %v1579_v35, %v1579_v35 }
 0x150   : > { %v836_v61 = vadd.f32 %v835_v60, %v1576_v27  ;;  %v905_v0 = vadd.f32 %v904_v59, %v874_v33 }
 0x152   : > { %v906_v2 = vadd.f32 %v905_v0, %v875_v57  ;;  %v837_v5 = vadd.f32 %v836_v61, %v1587_v42 }
 0x154   : > { %v838_v4 = vadd.f32 %v1572_v23, %v837_v5  ;;  %v907_v6 = vadd.f32 %v906_v2, %v876_v3  ;;  %v881_v23 = vmul.f32 %v1596_v62, %v1596_v62 }
 0x156   : > { %v908_v7 = vadd.f32 %v907_v6, %v877_v55  ;;  %v839_v27 = vadd.f32 %v1579_v35, %v838_v4 }
 0x158   : > { %v840_v10 = vadd.f32 %v839_v27, %v1600_v1  ;;  %v909_v11 = vadd.f32 %v908_v7, %v878_v63 }
 0x15a   : > { %v910_v42 = vadd.f32 %v909_v11, %v879_v9  ;;  %v841_v12 = vadd.f32 %v840_v10, %v602_v14 }
 0x15c   : > { %v842_v15 = vadd.f32 %v1596_v62, %v841_v12  ;;  %v911_v16 = vadd.f32 %v910_v42, %v880_v13 }
 0x15e   : > { %v843_v35 = vadd.f32 %v1603_v8, %v842_v15  ;;  %v912_v18 = vadd.f32 %v911_v16, %v881_v23 }
 0x160   : > { %v844_v19 = vrot.slane %v843_v35, 4  ;;  %v913_v20 = vadd.f32 %v912_v18, %v882_v17 }
 0x162   : > { %v845_v1 = vadd.f32 %v844_v19, %v843_v35  ;;  %v914_v21 = vrot.slane %v913_v20, 4 }
 0x164   : > { %v846_v22 = vrot.slane %v845_v1, 2  ;;  %v915_v25 = vadd.f32 %v914_v21, %v913_v20 }
 0x166   : > { %v847_v14 = vadd.f32 %v846_v22, %v845_v1  ;;  %v916_v28 = vrot.slane %v915_v25, 2 }
 0x168   : > { %v848_v30 = vrot.slane %v847_v14, 1  ;;  %v917_v31 = vadd.f32 %v916_v28, %v915_v25 }
 0x16a   : > { %v849_v62 = vadd.f32 %v848_v30, %v847_v14  ;;  %v918_v32 = vrot.slane %v917_v31, 1 }
 0x16c   : > { %850 = vst [vmem:[%s256_s25] sm:$0x1] %v849_v62  ;;  %v919_v8 = vadd.f32 %v918_v32, %v917_v31 }
 0x16e   : > { %920 = vst [vmem:[%s259_s28] sm:$0x1] %v919_v8 }
 0x16f PF: > { %s17_s18 = sadd.s32 1, %s1407_s18  }
 0x170   : > { %p14_p5 = scmp.ge.s32.totalorder %s17_s18, 4  }
 0x172   :  { %16 = sbr.rel (!%p14_p5) target bundleno = 1 (0x1), region = 91 }
 0x179   :  { %967 = vsyncpa [#allocation3], 1 }
 0x17a   :  { %969 = vsyncpa [#allocation3 + $0x1], 1 }

// kernel: _lambda_.3
= control target key start
LH: loop header
LB: loop body
LE: loop exit
PB: predicated region body
PF: predicated region fallthrough
CT: control target
= control target key end

     0   :  { %s1942_s12 = smov 0   ;;  %s2127_s0 = inlined_call_operand.vmem [shape: bf16[2048,128], index: 0, kind: input, shape index: {}]   ;;  %s2128_s1 = inlined_call_operand.vmem [shape: bf16[128,128], index: 1, kind: input, shape index: {}]   ;;  %s2129_s2 = inlined_call_operand.vmem [shape: f32[1,128], index: 2, kind: input, shape index: {}]   ;;  %s2130_s3 = inlined_call_operand.vmem [shape: bf16[2048,128], index: 3, kind: output, shape index: {}]  }
   0x1 LB: > { %s1231_s13 = sadd.s32 4294967295, %s1920_s12   ;;  %p1235_p0 = scmp.ge.s32.totalorder %s1920_s12, 1  ;;  %s1920_s12 = sphi %s1942_s12, %s13_s12  }
   0x2   : > { %p138_p1 = scmp.lt.s32.totalorder %s1920_s12, 5 }
   0x4   : > { %p139_p2 = pnand %p1235_p0, %p138_p1 }
   0x5   : > { %v1746_v0 = vld [vmem:[%s2128_s1] sm:$0xff] (!%p139_p2)   ;;  %s1236_s16 = sshll.u32 (!%p139_p2), %s1231_s13, 6  ;;  %v1747_v1 = vld [vmem:[%s2128_s1 + $0x8] sm:$0xff] (!%p139_p2)   ;;  %v1748_v2 = vld [vmem:[%s2128_s1 + $0x10] sm:$0xff] (!%p139_p2)  }
   0x6   : > { %142 = sbr.rel (%p139_p2) target bundleno = 332 (0x14c), region = 32  ;;  %p163_p3 = scmp.lt.s32.totalorder (!%p139_p2), %s1236_s16, 255  ;;  %1642 = vmatprep.subr.bf16.mxu0 (!%p139_p2), %v1746_v0  ;;  %1722 = vmatprep.subr.bf16.mxu1 (!%p139_p2), %v1746_v0  ;;  %v1749_v3 = vld [vmem:[%s2128_s1 + $0x18] sm:$0xff] (!%p139_p2)   ;;  %v1750_v6 = vld [vmem:[%s2128_s1 + $0x20] sm:$0xff] (!%p139_p2)   ;;  %v1751_v7 = vld [vmem:[%s2128_s1 + $0x28] sm:$0xff] (!%p139_p2)  }
   0x7   : > { %1643 = vmatpush3.bf16.msra.mxu0 (!%p139_p2), %v1746_v0  ;;  %1730 = vmatpush3.bf16.msra.mxu1 (!%p139_p2), %v1746_v0  ;;  %v1752_v8 = vld [vmem:[%s2128_s1 + $0x30] sm:$0xff] (!%p139_p2)   ;;  %v1753_v9 = vld [vmem:[%s2128_s1 + $0x38] sm:$0xff] (!%p139_p2)   ;;  %v2019_v40 = vld [vmem:[%s2129_s2] ss:$0 sm:$0xff] (!%p139_p2) }
   0x8   : > { %1644 = vmatprep.subr.bf16.mxu0 (!%p139_p2), %v1747_v1  ;;  %1723 = vmatprep.subr.bf16.mxu1 (!%p139_p2), %v1747_v1 }
   0xb   : > { %1645 = vmatpush3.bf16.msra.mxu0 (!%p139_p2), %v1747_v1  ;;  %1731 = vmatpush3.bf16.msra.mxu1 (!%p139_p2), %v1747_v1 }
   0xc   : > { %1646 = vmatprep.subr.bf16.mxu0 (!%p139_p2), %v1748_v2  ;;  %1724 = vmatprep.subr.bf16.mxu1 (!%p139_p2), %v1748_v2 }
   0xd   : > { %s2132_s16 = smov (!%p163_p3, %s1236_s16), 255 }
   0xe   : > { %s1237_s21 = sshll.u32 %s2132_s16, 2 }
   0xf   : > { %s1967_s24 = scalar_lea.vmem %s2127_s0, %s1237_s21  ;;  %1647 = vmatpush3.bf16.msra.mxu0 %v1748_v2  ;;  %1732 = vmatpush3.bf16.msra.mxu1 %v1748_v2  ;;  %s2042_s13 = scalar_lea.vmem %s2130_s3, %s1237_s21 }
  0x10   : > { %v1754_v4 = vld [vmem:[%s1967_s24] sm:$0xff]   ;;  %1648 = vmatprep.subr.bf16.mxu0 %v1749_v3  ;;  %1725 = vmatprep.subr.bf16.mxu1 %v1749_v3  ;;  %v1756_v10 = vld [vmem:[%s1967_s24 + $0x8] sm:$0xff]   ;;  %v1758_v12 = vld [vmem:[%s1967_s24 + $0x10] sm:$0xff]  }
  0x11   : > { %v1755_v5 = vld [vmem:[%s1967_s24 + $0x80] sm:$0xff]   ;;  %1658 = vmatprep.mubr.bf16.mxu0 %v1754_v4  ;;  %v1757_v11 = vld [vmem:[%s1967_s24 + $0x88] sm:$0xff]   ;;  %v1759_v13 = vld [vmem:[%s1967_s24 + $0x90] sm:$0xff]  }
  0x12   : > { %1690 = vmatprep.mubr.bf16.mxu1 %v1755_v5  ;;  %v1760_v14 = vld [vmem:[%s1967_s24 + $0x18] sm:$0xff]   ;;  %v1762_v16 = vld [vmem:[%s1967_s24 + $0x20] sm:$0xff]   ;;  %v1764_v18 = vld [vmem:[%s1967_s24 + $0x28] sm:$0xff]  }
  0x13   : > { %1649 = vmatpush3.bf16.msra.mxu0 %v1749_v3  ;;  %1733 = vmatpush3.bf16.msra.mxu1 %v1749_v3  ;;  %v1761_v15 = vld [vmem:[%s1967_s24 + $0x98] sm:$0xff]   ;;  %v1763_v17 = vld [vmem:[%s1967_s24 + $0xa0] sm:$0xff]   ;;  %v1765_v19 = vld [vmem:[%s1967_s24 + $0xa8] sm:$0xff]  }
  0x14   : > { %1650 = vmatprep.subr.bf16.mxu0 %v1750_v6  ;;  %1726 = vmatprep.subr.bf16.mxu1 %v1750_v6  ;;  %v1766_v20 = vld [vmem:[%s1967_s24 + $0x30] sm:$0xff]   ;;  %v1768_v22 = vld [vmem:[%s1967_s24 + $0x38] sm:$0xff]   ;;  %v1770_v24 = vld [vmem:[%s1967_s24 + $0x40] sm:$0xff]  }
  0x15   : > { %v1767_v21 = vld [vmem:[%s1967_s24 + $0xb0] sm:$0xff]   ;;  %v1769_v23 = vld [vmem:[%s1967_s24 + $0xb8] sm:$0xff]   ;;  %v1771_v25 = vld [vmem:[%s1967_s24 + $0xc0] sm:$0xff]  }
  0x16   : > { %v1772_v26 = vld [vmem:[%s1967_s24 + $0x48] sm:$0xff]   ;;  %v1774_v28 = vld [vmem:[%s1967_s24 + $0x50] sm:$0xff]   ;;  %v1776_v30 = vld [vmem:[%s1967_s24 + $0x58] sm:$0xff]  }
  0x17   : > { %1651 = vmatpush3.bf16.msra.mxu0 %v1750_v6  ;;  %1734 = vmatpush3.bf16.msra.mxu1 %v1750_v6  ;;  %v1773_v27 = vld [vmem:[%s1967_s24 + $0xc8] sm:$0xff]   ;;  %v1775_v29 = vld [vmem:[%s1967_s24 + $0xd0] sm:$0xff]   ;;  %v1777_v31 = vld [vmem:[%s1967_s24 + $0xd8] sm:$0xff]  }
  0x18   : > { %1652 = vmatprep.subr.bf16.mxu0 %v1751_v7  ;;  %1727 = vmatprep.subr.bf16.mxu1 %v1751_v7  ;;  %v1778_v32 = vld [vmem:[%s1967_s24 + $0x60] sm:$0xff]   ;;  %v1780_v34 = vld [vmem:[%s1967_s24 + $0x68] sm:$0xff]   ;;  %v1782_v36 = vld [vmem:[%s1967_s24 + $0x70] sm:$0xff]  }
  0x19   : > { %v1779_v33 = vld [vmem:[%s1967_s24 + $0xe0] sm:$0xff]   ;;  %v1781_v35 = vld [vmem:[%s1967_s24 + $0xe8] sm:$0xff]   ;;  %v1783_v37 = vld [vmem:[%s1967_s24 + $0xf0] sm:$0xff]  }
  0x1a   : > { %v1784_v38 = vld [vmem:[%s1967_s24 + $0x78] sm:$0xff]  }
  0x1b   : > { %1653 = vmatpush3.bf16.msra.mxu0 %v1751_v7  ;;  %1735 = vmatpush3.bf16.msra.mxu1 %v1751_v7  ;;  %v1785_v39 = vld [vmem:[%s1967_s24 + $0xf8] sm:$0xff]  }
  0x1c   : > { %1654 = vmatprep.subr.bf16.mxu0 %v1752_v8  ;;  %1728 = vmatprep.subr.bf16.mxu1 %v1752_v8 }
  0x1f   : > { %1655 = vmatpush3.bf16.msra.mxu0 %v1752_v8  ;;  %1736 = vmatpush3.bf16.msra.mxu1 %v1752_v8 }
  0x20   : > { %1656 = vmatprep.subr.bf16.mxu0 %v1753_v9  ;;  %1729 = vmatprep.subr.bf16.mxu1 %v1753_v9 }
  0x23   : > { %1657 = vmatpush3.bf16.msra.mxu0 %v1753_v9  ;;  %1737 = vmatpush3.bf16.msra.mxu1 %v1753_v9 }
  0x26   : > { %1659 = vmatmul.mubr.bf16.vlgmr.msra.gmra.mrb[0].mxu0 %v1756_v10  ;;  %1691 = vmatmul.mubr.bf16.vlgmr.msra.gmra.mrb[0].mxu1 %v1757_v11 }
  0x27   : > { %1662 = vmatprep.mubr.bf16.mxu0 %v1758_v12  ;;  %1694 = vmatprep.mubr.bf16.mxu1 %v1759_v13 }
  0x2e   : > { %1663 = vmatmul.mubr.bf16.gmra.mrb[4].mxu0 %v1760_v14  ;;  %1695 = vmatmul.mubr.bf16.gmra.mrb[4].mxu1 %v1761_v15 }
  0x2f   : > { %1666 = vmatprep.mubr.bf16.mxu0 %v1762_v16  ;;  %1698 = vmatprep.mubr.bf16.mxu1 %v1763_v17 }
  0x36   : > { %1667 = vmatmul.mubr.bf16.gmra.mrb[8].mxu0 %v1764_v18  ;;  %1699 = vmatmul.mubr.bf16.gmra.mrb[8].mxu1 %v1765_v19 }
  0x37   : > { %1670 = vmatprep.mubr.bf16.mxu0 %v1766_v20  ;;  %1702 = vmatprep.mubr.bf16.mxu1 %v1767_v21 }
  0x3e   : > { %1671 = vmatmul.mubr.bf16.gmra.mrb[12].mxu0 %v1768_v22  ;;  %1703 = vmatmul.mubr.bf16.gmra.mrb[12].mxu1 %v1769_v23 }
  0x3f   : > { %1674 = vmatprep.mubr.bf16.mxu0 %v1770_v24  ;;  %1706 = vmatprep.mubr.bf16.mxu1 %v1771_v25 }
  0x46   : > { %1675 = vmatmul.mubr.bf16.gmra.mrb[16].mxu0 %v1772_v26  ;;  %1707 = vmatmul.mubr.bf16.gmra.mrb[16].mxu1 %v1773_v27 }
  0x47   : > { %1678 = vmatprep.mubr.bf16.mxu0 %v1774_v28  ;;  %1710 = vmatprep.mubr.bf16.mxu1 %v1775_v29 }
  0x4e   : > { %1679 = vmatmul.mubr.bf16.gmra.mrb[20].mxu0 %v1776_v30  ;;  %1711 = vmatmul.mubr.bf16.gmra.mrb[20].mxu1 %v1777_v31 }
  0x4f   : > { %1682 = vmatprep.mubr.bf16.mxu0 %v1778_v32  ;;  %1714 = vmatprep.mubr.bf16.mxu1 %v1779_v33 }
  0x56   : > { %1683 = vmatmul.mubr.bf16.gmra.mrb[24].mxu0 %v1780_v34  ;;  %1715 = vmatmul.mubr.bf16.gmra.mrb[24].mxu1 %v1781_v35 }
  0x57   : > { %1686 = vmatprep.mubr.bf16.mxu0 %v1782_v36  ;;  %1718 = vmatprep.mubr.bf16.mxu1 %v1783_v37 }
  0x5e   : > { %1687 = vmatmul.mubr.bf16.gmra.mrb[28].mxu0 %v1784_v38  ;;  %1719 = vmatmul.mubr.bf16.gmra.mrb[28].mxu1 %v1785_v39 }
  0xf9   : > { %v1660_v41 = vpop.f32.mrb[0].mxu0  ;;  %v1692_v42 = vpop.f32.mrb[0].mxu1 }
  0xfa   : > { %v545_v43 = vadd.f32 %v1660_v41, %v2019_v40  ;;  %v673_v44 = vadd.f32 %v1692_v42, %v2019_v40  ;;  %v536_v45 = vpop.f32.mrb[1].mxu0  ;;  %v664_v46 = vpop.f32.mrb[1].mxu1 }
  0xfb   : > { %v537_v47 = vadd.f32 %v2019_v40, %v536_v45  ;;  %v665_v48 = vadd.f32 %v2019_v40, %v664_v46  ;;  %v1661_v49 = vpop.f32.mrb[2].mxu0  ;;  %v1693_v50 = vpop.f32.mrb[2].mxu1 }
  0xfc   : > { %1786 = vtanh.f32 %v545_v43  ;;  %v548_v51 = vadd.f32 %v1661_v49, %v2019_v40  ;;  %v539_v52 = vpop.f32.mrb[3].mxu0  ;;  %v667_v53 = vpop.f32.mrb[3].mxu1  ;;  %v676_v54 = vadd.f32 %v1693_v50, %v2019_v40 }
  0xfd   : > { %1788 = vtanh.f32 %v673_v44  ;;  %v540_v55 = vadd.f32 %v2019_v40, %v539_v52  ;;  %v668_v56 = vadd.f32 %v2019_v40, %v667_v53 }
  0xfe   : > { %1790 = vtanh.f32 %v537_v47 }
  0xff   : > { %1792 = vtanh.f32 %v665_v48 }
 0x100   : > { %1794 = vtanh.f32 %v548_v51 }
 0x101   : > { %1796 = vtanh.f32 %v676_v54  ;;  %v1664_v57 = vpop.f32.mrb[4].mxu0  ;;  %v1696_v58 = vpop.f32.mrb[4].mxu1 }
 0x102   : > { %1798 = vtanh.f32 %v540_v55  ;;  %v561_v59 = vadd.f32 %v1664_v57, %v2019_v40  ;;  %v689_v60 = vadd.f32 %v1696_v58, %v2019_v40  ;;  %v552_v61 = vpop.f32.mrb[5].mxu0  ;;  %v680_v62 = vpop.f32.mrb[5].mxu1 }
 0x103   : > { %1800 = vtanh.f32 %v668_v56  ;;  %v553_v63 = vadd.f32 %v2019_v40, %v552_v61  ;;  %v681_v0 = vadd.f32 %v2019_v40, %v680_v62  ;;  %v1665_v1 = vpop.f32.mrb[6].mxu0  ;;  %v1697_v2 = vpop.f32.mrb[6].mxu1 }
 0x104   : > { %1802 = vtanh.f32 %v561_v59  ;;  %v564_v3 = vadd.f32 %v1665_v1, %v2019_v40  ;;  %v555_v4 = vpop.f32.mrb[7].mxu0  ;;  %v683_v5 = vpop.f32.mrb[7].mxu1  ;;  %v692_v6 = vadd.f32 %v1697_v2, %v2019_v40 }
 0x105   : > { %1804 = vtanh.f32 %v689_v60  ;;  %v556_v8 = vadd.f32 %v2019_v40, %v555_v4  ;;  %v684_v10 = vadd.f32 %v2019_v40, %v683_v5 }
 0x106   : > { %v1787_v7 = vpop.eup %1786  ;;  %1806 = vtanh.f32 %v553_v63 }
 0x107   : > { %v1789_v9 = vpop.eup %1788  ;;  %1808 = vtanh.f32 %v681_v0 }
 0x108   : > { %v1791_v11 = vpop.eup %1790  ;;  %1810 = vtanh.f32 %v564_v3 }
 0x109   : > { %v1793_v12 = vpop.eup %1792  ;;  %1812 = vtanh.f32 %v692_v6  ;;  %v1668_v13 = vpop.f32.mrb[8].mxu0 }
 0x10a   : > { %v1700_v14 = vpop.f32.mrb[8].mxu1  ;;  %v1795_v15 = vpop.eup %1794  ;;  %1814 = vtanh.f32 %v556_v8  ;;  %v577_v16 = vadd.f32 %v1668_v13, %v2019_v40 }
 0x10b   : > { %v705_v17 = vadd.f32 %v1700_v14, %v2019_v40  ;;  %v568_v18 = vpop.f32.mrb[9].mxu0  ;;  %v696_v19 = vpop.f32.mrb[9].mxu1  ;;  %v1419_v21 = vpack.c.bf16 %v1795_v15, %v1787_v7  ;;  %1816 = vtanh.f32 %v684_v10 }
 0x10c   : > { %v1797_v20 = vpop.eup %1796  ;;  %v569_v22 = vadd.f32 %v2019_v40, %v568_v18  ;;  %v697_v23 = vadd.f32 %v2019_v40, %v696_v19  ;;  %v1669_v24 = vpop.f32.mrb[10].mxu0  ;;  %1818 = vtanh.f32 %v577_v16 }
 0x10d   : > { %v1701_v25 = vpop.f32.mrb[10].mxu1  ;;  %v1799_v26 = vpop.eup %1798  ;;  %v1499_v27 = vpack.c.bf16 %v1797_v20, %v1789_v9  ;;  %v580_v28 = vadd.f32 %v1669_v24, %v2019_v40  ;;  %1571 = vst [vmem:[%s2042_s13 + $0x8] sm:$0xff] %v1419_v21   ;;  %1820 = vtanh.f32 %v705_v17 }
 0x10e   : > { %v571_v29 = vpop.f32.mrb[11].mxu0  ;;  %v699_v30 = vpop.f32.mrb[11].mxu1  ;;  %v1414_v32 = vpack.c.bf16 %v1799_v26, %v1791_v11  ;;  %v708_v33 = vadd.f32 %v1701_v25, %v2019_v40  ;;  %1822 = vtanh.f32 %v569_v22 }
 0x10f   : > { %v1801_v31 = vpop.eup %1800  ;;  %1587 = vst [vmem:[%s2042_s13 + $0x88] sm:$0xff] %v1499_v27   ;;  %v572_v36 = vadd.f32 %v2019_v40, %v571_v29  ;;  %1824 = vtanh.f32 %v697_v23  ;;  %v700_v38 = vadd.f32 %v2019_v40, %v699_v30 }
 0x110   : > { %v1803_v34 = vpop.eup %1802  ;;  %v1494_v35 = vpack.c.bf16 %v1801_v31, %v1793_v12  ;;  %1415 = vst [vmem:[%s2042_s13] sm:$0xff] %v1414_v32   ;;  %1826 = vtanh.f32 %v580_v28 }
 0x111   : > { %v1805_v37 = vpop.eup %1804  ;;  %1828 = vtanh.f32 %v708_v33  ;;  %v1672_v42 = vpop.f32.mrb[12].mxu0 }
 0x112   : > { %v1807_v39 = vpop.eup %1806  ;;  %1586 = vst [vmem:[%s2042_s13 + $0x80] sm:$0xff] %v1494_v35   ;;  %v1704_v43 = vpop.f32.mrb[12].mxu1  ;;  %1830 = vtanh.f32 %v572_v36  ;;  %v593_v45 = vadd.f32 %v1672_v42, %v2019_v40 }
 0x113   : > { %v1809_v41 = vpop.eup %1808  ;;  %v721_v46 = vadd.f32 %v1704_v43, %v2019_v40  ;;  %v584_v47 = vpop.f32.mrb[13].mxu0  ;;  %1832 = vtanh.f32 %v700_v38 }
 0x114   : > { %v1811_v44 = vpop.eup %1810  ;;  %v712_v48 = vpop.f32.mrb[13].mxu1  ;;  %v585_v51 = vadd.f32 %v2019_v40, %v584_v47  ;;  %1834 = vtanh.f32 %v593_v45 }
 0x115   : > { %v1813_v49 = vpop.eup %1812  ;;  %v1429_v50 = vpack.c.bf16 %v1811_v44, %v1803_v34  ;;  %v713_v52 = vadd.f32 %v2019_v40, %v712_v48  ;;  %v1673_v53 = vpop.f32.mrb[14].mxu0  ;;  %1836 = vtanh.f32 %v721_v46 }
 0x116   : > { %v1705_v54 = vpop.f32.mrb[14].mxu1  ;;  %v1815_v55 = vpop.eup %1814  ;;  %v1509_v56 = vpack.c.bf16 %v1813_v49, %v1805_v37  ;;  %v596_v57 = vadd.f32 %v1673_v53, %v2019_v40  ;;  %1838 = vtanh.f32 %v585_v51 }
 0x117   : > { %v587_v58 = vpop.f32.mrb[15].mxu0  ;;  %v715_v59 = vpop.f32.mrb[15].mxu1  ;;  %1573 = vst [vmem:[%s2042_s13 + $0x18] sm:$0xff] %v1429_v50   ;;  %v1424_v61 = vpack.c.bf16 %v1815_v55, %v1807_v39  ;;  %v724_v62 = vadd.f32 %v1705_v54, %v2019_v40  ;;  %1840 = vtanh.f32 %v713_v52 }
 0x118   : > { %v1817_v60 = vpop.eup %1816  ;;  %1589 = vst [vmem:[%s2042_s13 + $0x98] sm:$0xff] %v1509_v56   ;;  %v588_v1 = vadd.f32 %v2019_v40, %v587_v58  ;;  %v716_v3 = vadd.f32 %v2019_v40, %v715_v59  ;;  %1842 = vtanh.f32 %v596_v57 }
 0x119   : > { %v1819_v63 = vpop.eup %1818  ;;  %v1504_v0 = vpack.c.bf16 %v1817_v60, %v1809_v41  ;;  %1572 = vst [vmem:[%s2042_s13 + $0x10] sm:$0xff] %v1424_v61   ;;  %1844 = vtanh.f32 %v724_v62  ;;  %v1676_v6 = vpop.f32.mrb[16].mxu0 }
 0x11a   : > { %v1821_v2 = vpop.eup %1820  ;;  %v1708_v7 = vpop.f32.mrb[16].mxu1  ;;  %1846 = vtanh.f32 %v588_v1  ;;  %v609_v9 = vadd.f32 %v1676_v6, %v2019_v40 }
 0x11b   : > { %v1823_v4 = vpop.eup %1822  ;;  %1588 = vst [vmem:[%s2042_s13 + $0x90] sm:$0xff] %v1504_v0   ;;  %v737_v10 = vadd.f32 %v1708_v7, %v2019_v40  ;;  %v600_v11 = vpop.f32.mrb[17].mxu0  ;;  %1848 = vtanh.f32 %v716_v3 }
 0x11c   : > { %v1825_v5 = vpop.eup %1824  ;;  %v728_v12 = vpop.f32.mrb[17].mxu1  ;;  %v601_v15 = vadd.f32 %v2019_v40, %v600_v11  ;;  %1850 = vtanh.f32 %v609_v9 }
 0x11d   : > { %v1827_v8 = vpop.eup %1826  ;;  %v729_v16 = vadd.f32 %v2019_v40, %v728_v12  ;;  %v1677_v17 = vpop.f32.mrb[18].mxu0  ;;  %1852 = vtanh.f32 %v737_v10 }
 0x11e   : > { %v1829_v13 = vpop.eup %1828  ;;  %v1439_v14 = vpack.c.bf16 %v1827_v8, %v1819_v63  ;;  %v1709_v18 = vpop.f32.mrb[18].mxu1  ;;  %v612_v21 = vadd.f32 %v1677_v17, %v2019_v40  ;;  %1854 = vtanh.f32 %v601_v15 }
 0x11f   : > { %v1831_v19 = vpop.eup %1830  ;;  %v1519_v20 = vpack.c.bf16 %v1829_v13, %v1821_v2  ;;  %v603_v22 = vpop.f32.mrb[19].mxu0  ;;  %v740_v26 = vadd.f32 %v1709_v18, %v2019_v40  ;;  %1856 = vtanh.f32 %v729_v16 }
 0x120   : > { %v731_v23 = vpop.f32.mrb[19].mxu1  ;;  %v1833_v24 = vpop.eup %1832  ;;  %1575 = vst [vmem:[%s2042_s13 + $0x28] sm:$0xff] %v1439_v14   ;;  %v1434_v25 = vpack.c.bf16 %v1831_v19, %v1823_v4  ;;  %v604_v29 = vadd.f32 %v2019_v40, %v603_v22  ;;  %1858 = vtanh.f32 %v612_v21 }
 0x121   : > { %v1835_v27 = vpop.eup %1834  ;;  %1591 = vst [vmem:[%s2042_s13 + $0xa8] sm:$0xff] %v1519_v20   ;;  %v1514_v28 = vpack.c.bf16 %v1833_v24, %v1825_v5  ;;  %v732_v31 = vadd.f32 %v2019_v40, %v731_v23  ;;  %1860 = vtanh.f32 %v740_v26  ;;  %v1680_v34 = vpop.f32.mrb[20].mxu0 }
 0x122   : > { %v1837_v30 = vpop.eup %1836  ;;  %1574 = vst [vmem:[%s2042_s13 + $0x20] sm:$0xff] %v1434_v25   ;;  %v1712_v35 = vpop.f32.mrb[20].mxu1  ;;  %1862 = vtanh.f32 %v604_v29  ;;  %v625_v37 = vadd.f32 %v1680_v34, %v2019_v40 }
 0x123   : > { %v1839_v32 = vpop.eup %1838  ;;  %1590 = vst [vmem:[%s2042_s13 + $0xa0] sm:$0xff] %v1514_v28   ;;  %v753_v38 = vadd.f32 %v1712_v35, %v2019_v40  ;;  %v616_v39 = vpop.f32.mrb[21].mxu0  ;;  %1864 = vtanh.f32 %v732_v31 }
 0x124   : > { %v1841_v33 = vpop.eup %1840  ;;  %v744_v41 = vpop.f32.mrb[21].mxu1  ;;  %v617_v44 = vadd.f32 %v2019_v40, %v616_v39  ;;  %1866 = vtanh.f32 %v625_v37 }
 0x125   : > { %v1843_v36 = vpop.eup %1842  ;;  %v745_v45 = vadd.f32 %v2019_v40, %v744_v41  ;;  %v1681_v46 = vpop.f32.mrb[22].mxu0  ;;  %1868 = vtanh.f32 %v753_v38 }
 0x126   : > { %v1845_v42 = vpop.eup %1844  ;;  %v1449_v43 = vpack.c.bf16 %v1843_v36, %v1835_v27  ;;  %v1713_v47 = vpop.f32.mrb[22].mxu1  ;;  %v628_v50 = vadd.f32 %v1681_v46, %v2019_v40  ;;  %1870 = vtanh.f32 %v617_v44 }
 0x127   : > { %v1847_v48 = vpop.eup %1846  ;;  %v1529_v49 = vpack.c.bf16 %v1845_v42, %v1837_v30  ;;  %v619_v51 = vpop.f32.mrb[23].mxu0  ;;  %v756_v55 = vadd.f32 %v1713_v47, %v2019_v40  ;;  %1872 = vtanh.f32 %v745_v45 }
 0x128   : > { %v747_v52 = vpop.f32.mrb[23].mxu1  ;;  %v1849_v53 = vpop.eup %1848  ;;  %1577 = vst [vmem:[%s2042_s13 + $0x38] sm:$0xff] %v1449_v43   ;;  %v1444_v54 = vpack.c.bf16 %v1847_v48, %v1839_v32  ;;  %v620_v58 = vadd.f32 %v2019_v40, %v619_v51  ;;  %1874 = vtanh.f32 %v628_v50 }
 0x129   : > { %v1851_v56 = vpop.eup %1850  ;;  %1593 = vst [vmem:[%s2042_s13 + $0xb8] sm:$0xff] %v1529_v49   ;;  %v1524_v57 = vpack.c.bf16 %v1849_v53, %v1841_v33  ;;  %v748_v60 = vadd.f32 %v2019_v40, %v747_v52  ;;  %1876 = vtanh.f32 %v756_v55  ;;  %v1684_v63 = vpop.f32.mrb[24].mxu0 }
 0x12a   : > { %v1853_v59 = vpop.eup %1852  ;;  %1576 = vst [vmem:[%s2042_s13 + $0x30] sm:$0xff] %v1444_v54   ;;  %v1716_v0 = vpop.f32.mrb[24].mxu1  ;;  %1878 = vtanh.f32 %v620_v58  ;;  %v641_v2 = vadd.f32 %v1684_v63, %v2019_v40 }
 0x12b   : > { %v1855_v61 = vpop.eup %1854  ;;  %1592 = vst [vmem:[%s2042_s13 + $0xb0] sm:$0xff] %v1524_v57   ;;  %v769_v3 = vadd.f32 %v1716_v0, %v2019_v40  ;;  %v632_v4 = vpop.f32.mrb[25].mxu0  ;;  %1880 = vtanh.f32 %v748_v60 }
 0x12c   : > { %v1857_v62 = vpop.eup %1856  ;;  %v760_v5 = vpop.f32.mrb[25].mxu1  ;;  %v633_v8 = vadd.f32 %v2019_v40, %v632_v4  ;;  %1882 = vtanh.f32 %v641_v2 }
 0x12d   : > { %v1859_v1 = vpop.eup %1858  ;;  %v761_v9 = vadd.f32 %v2019_v40, %v760_v5  ;;  %v1685_v10 = vpop.f32.mrb[26].mxu0  ;;  %1884 = vtanh.f32 %v769_v3 }
 0x12e   : > { %v1861_v6 = vpop.eup %1860  ;;  %v1459_v7 = vpack.c.bf16 %v1859_v1, %v1851_v56  ;;  %v1717_v11 = vpop.f32.mrb[26].mxu1  ;;  %v644_v14 = vadd.f32 %v1685_v10, %v2019_v40  ;;  %1886 = vtanh.f32 %v633_v8 }
 0x12f   : > { %v1863_v12 = vpop.eup %1862  ;;  %v1539_v13 = vpack.c.bf16 %v1861_v6, %v1853_v59  ;;  %v635_v15 = vpop.f32.mrb[27].mxu0  ;;  %v772_v19 = vadd.f32 %v1717_v11, %v2019_v40  ;;  %1888 = vtanh.f32 %v761_v9 }
 0x130   : > { %v763_v16 = vpop.f32.mrb[27].mxu1  ;;  %v1865_v17 = vpop.eup %1864  ;;  %1579 = vst [vmem:[%s2042_s13 + $0x48] sm:$0xff] %v1459_v7   ;;  %v1454_v18 = vpack.c.bf16 %v1863_v12, %v1855_v61  ;;  %v636_v22 = vadd.f32 %v2019_v40, %v635_v15  ;;  %1890 = vtanh.f32 %v644_v14 }
 0x131   : > { %v1867_v20 = vpop.eup %1866  ;;  %1595 = vst [vmem:[%s2042_s13 + $0xc8] sm:$0xff] %v1539_v13   ;;  %v1534_v21 = vpack.c.bf16 %v1865_v17, %v1857_v62  ;;  %v764_v24 = vadd.f32 %v2019_v40, %v763_v16  ;;  %1892 = vtanh.f32 %v772_v19  ;;  %v1688_v27 = vpop.f32.mrb[28].mxu0 }
 0x132   : > { %v1869_v23 = vpop.eup %1868  ;;  %1578 = vst [vmem:[%s2042_s13 + $0x40] sm:$0xff] %v1454_v18   ;;  %v1720_v28 = vpop.f32.mrb[28].mxu1  ;;  %1894 = vtanh.f32 %v636_v22  ;;  %v657_v30 = vadd.f32 %v1688_v27, %v2019_v40 }
 0x133   : > { %v1871_v25 = vpop.eup %1870  ;;  %1594 = vst [vmem:[%s2042_s13 + $0xc0] sm:$0xff] %v1534_v21   ;;  %v785_v31 = vadd.f32 %v1720_v28, %v2019_v40  ;;  %v648_v32 = vpop.f32.mrb[29].mxu0  ;;  %1896 = vtanh.f32 %v764_v24 }
 0x134   : > { %v1873_v26 = vpop.eup %1872  ;;  %v776_v33 = vpop.f32.mrb[29].mxu1  ;;  %v649_v36 = vadd.f32 %v2019_v40, %v648_v32  ;;  %1898 = vtanh.f32 %v657_v30 }
 0x135   : > { %v1875_v29 = vpop.eup %1874  ;;  %v777_v37 = vadd.f32 %v2019_v40, %v776_v33  ;;  %v1689_v38 = vpop.f32.mrb[30].mxu0  ;;  %1900 = vtanh.f32 %v785_v31 }
 0x136   : > { %v1877_v34 = vpop.eup %1876  ;;  %v1469_v35 = vpack.c.bf16 %v1875_v29, %v1867_v20  ;;  %v1721_v39 = vpop.f32.mrb[30].mxu1  ;;  %v660_v43 = vadd.f32 %v1689_v38, %v2019_v40  ;;  %1902 = vtanh.f32 %v649_v36 }
 0x137   : > { %v1879_v41 = vpop.eup %1878  ;;  %v1549_v42 = vpack.c.bf16 %v1877_v34, %v1869_v23  ;;  %v651_v44 = vpop.f32.mrb[31].mxu0  ;;  %v788_v48 = vadd.f32 %v1721_v39, %v2019_v40  ;;  %1904 = vtanh.f32 %v777_v37 }
 0x138   : > { %v779_v45 = vpop.f32.mrb[31].mxu1  ;;  %v1881_v46 = vpop.eup %1880  ;;  %1581 = vst [vmem:[%s2042_s13 + $0x58] sm:$0xff] %v1469_v35   ;;  %v1464_v47 = vpack.c.bf16 %v1879_v41, %v1871_v25  ;;  %v652_v51 = vadd.f32 %v2019_v40, %v651_v44  ;;  %1906 = vtanh.f32 %v660_v43 }
 0x139   : > { %v1883_v49 = vpop.eup %1882  ;;  %1597 = vst [vmem:[%s2042_s13 + $0xd8] sm:$0xff] %v1549_v42   ;;  %v1544_v50 = vpack.c.bf16 %v1881_v46, %v1873_v26  ;;  %v780_v53 = vadd.f32 %v2019_v40, %v779_v45  ;;  %1908 = vtanh.f32 %v788_v48 }
 0x13a   : > { %v1885_v52 = vpop.eup %1884  ;;  %1580 = vst [vmem:[%s2042_s13 + $0x50] sm:$0xff] %v1464_v47   ;;  %1910 = vtanh.f32 %v652_v51 }
 0x13b   : > { %v1887_v54 = vpop.eup %1886  ;;  %1596 = vst [vmem:[%s2042_s13 + $0xd0] sm:$0xff] %v1544_v50   ;;  %1912 = vtanh.f32 %v780_v53 }
 0x13c   : > { %v1889_v55 = vpop.eup %1888 }
 0x13d   : > { %v1891_v56 = vpop.eup %1890 }
 0x13e   : > { %v1893_v57 = vpop.eup %1892  ;;  %v1479_v58 = vpack.c.bf16 %v1891_v56, %v1883_v49 }
 0x13f   : > { %v1895_v59 = vpop.eup %1894  ;;  %v1559_v60 = vpack.c.bf16 %v1893_v57, %v1885_v52 }
 0x140   : > { %v1897_v61 = vpop.eup %1896  ;;  %1583 = vst [vmem:[%s2042_s13 + $0x68] sm:$0xff] %v1479_v58   ;;  %v1474_v62 = vpack.c.bf16 %v1895_v59, %v1887_v54 }
 0x141   : > { %v1899_v40 = vpop.eup %1898  ;;  %1599 = vst [vmem:[%s2042_s13 + $0xe8] sm:$0xff] %v1559_v60   ;;  %v1554_v63 = vpack.c.bf16 %v1897_v61, %v1889_v55 }
 0x142   : > { %v1901_v0 = vpop.eup %1900  ;;  %1582 = vst [vmem:[%s2042_s13 + $0x60] sm:$0xff] %v1474_v62  }
 0x143   : > { %v1903_v1 = vpop.eup %1902  ;;  %1598 = vst [vmem:[%s2042_s13 + $0xe0] sm:$0xff] %v1554_v63  }
 0x144   : > { %v1905_v2 = vpop.eup %1904 }
 0x145   : > { %v1907_v3 = vpop.eup %1906 }
 0x146   : > { %v1909_v4 = vpop.eup %1908  ;;  %v1489_v5 = vpack.c.bf16 %v1907_v3, %v1899_v40 }
 0x147   : > { %v1911_v6 = vpop.eup %1910  ;;  %v1569_v7 = vpack.c.bf16 %v1909_v4, %v1901_v0 }
 0x148   : > { %v1913_v8 = vpop.eup %1912  ;;  %1585 = vst [vmem:[%s2042_s13 + $0x78] sm:$0xff] %v1489_v5   ;;  %v1484_v9 = vpack.c.bf16 %v1911_v6, %v1903_v1 }
 0x149   : > { %1601 = vst [vmem:[%s2042_s13 + $0xf8] sm:$0xff] %v1569_v7   ;;  %v1564_v10 = vpack.c.bf16 %v1913_v8, %v1905_v2 }
 0x14a   : > { %1584 = vst [vmem:[%s2042_s13 + $0x70] sm:$0xff] %v1484_v9  }
 0x14b   : > { %1600 = vst [vmem:[%s2042_s13 + $0xf0] sm:$0xff] %v1564_v10  }
 0x14c PF: > { %s13_s12 = sadd.s32 1, %s1920_s12  }
 0x14d   : > { %p10_p4 = scmp.ge.s32.totalorder %s13_s12, 6  }
 0x14f   :  { %12 = sbr.rel (!%p10_p4) target bundleno = 1 (0x1), region = 62 }

</bundles_post_ra>
